<compile_context>
chip_gen: v7x
topology: tpu7x:2x2x1
jax: 0.10.0
libtpu: 0.0.40
codegen_flags: <defaults>
</compile_context>

<pallas_src>
import functools

import jax
import jax.numpy as jnp
from jax.experimental import pallas as pl
from jax.experimental.pallas import tpu as pltpu


# --------------------------------------------------------------------------- #
# Helpers
# --------------------------------------------------------------------------- #
def _round_up(x, m):
    return (x + m - 1) // m * m


def _vmem_limit_bytes():
    """Generation-aware explicit scoped-VMEM limit.

    v5e/v6e: 128 MiB physical -> 64 MiB scoped limit; v7x: 64 MiB physical ->
    32 MiB scoped limit.  Falls back to the conservative (v7x) value if the
    hardware query is unavailable.
    """
    phys = None
    try:
        info = pltpu.get_tpu_info()
        phys = int(getattr(info, "vmem_capacity_bytes", 0)) or None
    except Exception:
        phys = None
    if phys is None:
        phys = 64 * 1024 * 1024
    return int(min(phys // 2, 64 * 1024 * 1024))


def _pick_tile_rows(ho, wp, wo, ksz_h, ksz_w, cin, cout,
                    in_itemsize, out_itemsize, n_batch, vmem_limit_bytes):
    """Pick TH = output rows per grid step.

    Accounts for the double-buffered input block AND the double-buffered
    output block, prefers large tiles (>=512 matmul lane-columns), and when
    the batch alone gives <2 grid steps tries to split rows so both v7x
    TensorCores get work ("parallel" grid axes).
    """
    budget = max(vmem_limit_bytes // 3, 2 * 1024 * 1024)  # headroom: weights, scratch

    def block_bytes(th):
        l_flat = _round_up((th + ksz_h - 1) * wp + (ksz_w - 1), 128)
        in_b = 2 * cin * l_flat * in_itemsize          # double-buffered input block
        out_b = 2 * cout * th * wo * out_itemsize      # double-buffered output block
        return in_b + out_b

    cands = [d for d in range(ho, 0, -1)
             if ho % d == 0 and (d == ho or d % 8 == 0)]
    fits = [d for d in cands if block_bytes(d) <= budget]
    if not fits:
        # TODO(synk): halo'd manual double-buffered row pipeline (make_async_copy,
        # memory_space=pl.ANY) for feature maps whose minimal row tile exceeds VMEM.
        raise ValueError(
            "Conv2dBlock Pallas kernel: smallest row tile needs "
            f"{block_bytes(cands[-1])} B of VMEM blocks, budget is {budget} B.")
    th = fits[0]
    # Megacore: ensure >=2 grid steps when possible, preferring >=512 columns.
    if n_batch * (ho // th) < 2:
        proper = [d for d in fits if d < ho]
        if proper:
            wide = [d for d in proper if d * wp >= 512]
            th = wide[0] if wide else proper[0]
    return th


def _spectral_sigma(w_mat, u, n_power_iterations=1, eps=1e-12):
    """torch.nn.utils.spectral_norm forward-time sigma (power iteration).

    Note: recomputes u/v but does not persist the updated u buffer — correct
    for an eval-style forward, differs from PyTorch training-time state.
    """
    def _l2n(v):
        return v / (jnp.linalg.norm(v) + eps)

    v = None
    for _ in range(n_power_iterations):
        v = _l2n(w_mat.T @ u)
        u = _l2n(w_mat @ v)
    return jnp.dot(u, w_mat @ v)


# --------------------------------------------------------------------------- #
# Pallas kernel
# --------------------------------------------------------------------------- #
def _conv_rows_kernel(w_ref, b_ref, s_ref, x_ref, o_ref, *,
                      KH, KW, Wp, Wo, TH, M_COMP):
    """One (batch, row-tile) step of the fused im2col convolution.

    w_ref: (KH*KW, Cout, Cin) bf16   raw (un-scaled) weight, tap-major
    b_ref: (Cout, 1)          f32    bias
    s_ref: (1,)               f32    1/sigma (spectral norm), in SMEM
    x_ref: (Cin, L_flat)      bf16   flattened padded row-tile (TH+KH-1 rows)
    o_ref: (Cout, TH, Wo)     f32    output rows, stored directly in NCHW
    """
    w_all = w_ref[...]                      # (KH*KW, Cout, Cin)
    acc = None
    for kh in range(KH):
        for kw in range(KW):
            t = kh * KW + kw
            off = kh * Wp + kw              # lane shift of this tap
            tap = x_ref[:, off:off + M_COMP]            # (Cin, TH*Wp), in-VMEM slice
            contrib = jnp.dot(w_all[t], tap,
                              preferred_element_type=jnp.float32)
            acc = contrib if acc is None else acc + contrib

    acc = acc * s_ref[0] + b_ref[...]       # fold 1/sigma, add bias (f32)
    # norm = identity, activation = identity (module defaults).

    # Strip the (KW-1) garbage columns per row and store directly into the
    # NCHW output block (no post-kernel transpose pass).
    for r in range(TH):
        o_ref[:, r, :] = acc[:, r * Wp: r * Wp + Wo].astype(o_ref.dtype)


# --------------------------------------------------------------------------- #
# Wrapper (pad + spectral-norm sigma are cheap XLA glue; conv is the kernel)
# --------------------------------------------------------------------------- #
def conv2d_block_forward(x_nchw, weight_oihw, bias, u, *,
                         padding=1, pad_type='reflect',
                         compute_dtype=jnp.bfloat16):
    """Conv2dBlock.forward: pad -> spectral_norm(conv) -> identity -> identity."""
    N, Cin, H, W = x_nchw.shape
    Cout, Cin_w, KH, KW = weight_oihw.shape
    assert Cin_w == Cin
    # TODO(synk): stride != 1 and non-identity norm/nl layers not implemented
    # (module defaults stride=1, norm=None, nl=None are used).

    # --- pad (XLA glue; fused with the flatten/cast below into one pass) ---
    if padding > 0:
        mode = {'reflect': 'reflect',
                'replicate': 'edge',
                'zero': 'constant'}[pad_type]
        x_pad = jnp.pad(
            x_nchw, ((0, 0), (0, 0), (padding, padding), (padding, padding)),
            mode=mode)
    else:
        x_pad = x_nchw
    Hp, Wp = H + 2 * padding, W + 2 * padding
    Ho, Wo = Hp - KH + 1, Wp - KW + 1            # stride = 1

    vmem_limit = _vmem_limit_bytes()
    in_item = jnp.dtype(compute_dtype).itemsize
    TH = _pick_tile_rows(Ho, Wp, Wo, KH, KW, Cin, Cout,
                         in_item, 4, N, vmem_limit)
    n_tiles = Ho // TH
    TH_in = TH + KH - 1                          # input rows per tile (with halo)
    M_COMP = TH * Wp                             # matmul lane-columns per step
    L_flat = _round_up(TH_in * Wp + (KW - 1), 128)

    # --- overlapping row tiles (halo = KH-1 rows); single tile => no copy ---
    if n_tiles == 1:
        tiles = x_pad[:, None]                                   # (N,1,Cin,Hp,Wp)
    else:
        tiles = jnp.stack(
            [x_pad[:, :, t * TH: t * TH + TH_in, :] for t in range(n_tiles)],
            axis=1)                                              # (N,T,Cin,TH_in,Wp)
    xt = tiles.reshape(N, n_tiles, Cin, TH_in * Wp)
    xt = jnp.pad(xt, ((0, 0), (0, 0), (0, 0), (0, L_flat - TH_in * Wp)))
    xt = xt.astype(compute_dtype)

    # --- spectral norm: sigma only; raw weight goes to the kernel ---
    sigma = _spectral_sigma(weight_oihw.reshape(Cout, -1), u)
    inv_sigma = (1.0 / sigma).reshape(1).astype(jnp.float32)

    w_taps = jnp.transpose(weight_oihw, (2, 3, 0, 1)) \
                .reshape(KH * KW, Cout, Cin).astype(compute_dtype)
    b_col = bias.reshape(Cout, 1).astype(jnp.float32)

    kernel = functools.partial(_conv_rows_kernel, KH=KH, KW=KW, Wp=Wp, Wo=Wo,
                               TH=TH, M_COMP=M_COMP)

    out = pl.pallas_call(
        kernel,
        out_shape=jax.ShapeDtypeStruct((N, Cout, Ho, Wo), jnp.float32),
        grid=(N, n_tiles),
        in_specs=[
            pl.BlockSpec((KH * KW, Cout, Cin), lambda n, t: (0, 0, 0)),
            pl.BlockSpec((Cout, 1), lambda n, t: (0, 0)),
            pl.BlockSpec(memory_space=pltpu.MemorySpace.SMEM),
            pl.BlockSpec((None, None, Cin, L_flat), lambda n, t: (n, t, 0, 0)),
        ],
        out_specs=pl.BlockSpec((None, Cout, TH, Wo), lambda n, t: (n, 0, t, 0)),
        compiler_params=pltpu.CompilerParams(
            dimension_semantics=("parallel", "parallel"),
            vmem_limit_bytes=vmem_limit),
    )(w_taps, b_col, inv_sigma, xt)
    return out


conv2d_block_forward = jax.jit(
    conv2d_block_forward,
    static_argnames=("padding", "pad_type", "compute_dtype"))


# --------------------------------------------------------------------------- #
# main
# --------------------------------------------------------------------------- #
if __name__ == "__main__":
    key = jax.random.PRNGKey(0)
    k_x, k_w, k_b, k_u = jax.random.split(key, 4)

    N, Cin, H, W = 2, 4, 16, 16
    Cout, K, PAD = 8, 3, 1

    x = jax.random.normal(k_x, (N, Cin, H, W), jnp.float32)
    weight = jax.random.normal(k_w, (Cout, Cin, K, K), jnp.float32) * 0.1
    bias = jax.random.normal(k_b, (Cout,), jnp.float32) * 0.1
    u0 = jax.random.normal(k_u, (Cout,), jnp.float32)
    u0 = u0 / (jnp.linalg.norm(u0) + 1e-12)

    y = conv2d_block_forward(x, weight, bias, u0, padding=PAD,
                             pad_type='reflect')
    y = jax.block_until_ready(y)

    # Reference: f32 lax conv (same semantics as F.conv2d) with spectral norm.
    x_pad = jnp.pad(x, ((0, 0), (0, 0), (PAD, PAD), (PAD, PAD)), mode='reflect')
    sigma = _spectral_sigma(weight.reshape(Cout, -1), u0)
    w_sn = weight / sigma
    y_ref = jax.lax.conv_general_dilated(
        x_pad, w_sn, window_strides=(1, 1), padding='VALID',
        dimension_numbers=('NCHW', 'OIHW', 'NCHW'))
    y_ref = y_ref + bias.reshape(1, Cout, 1, 1)

    assert y.shape == (N, Cout, H, W), y.shape
    # bf16 matmul operands (f32 accumulation) -> relaxed tolerance vs f32 ref.
    assert jnp.allclose(y, y_ref, atol=3e-2, rtol=3e-2), \
        float(jnp.max(jnp.abs(y - y_ref)))

    print("KERNEL_OK")
</pallas_src>

<mosaic_0001>
module attributes {stable_mosaic.version = 11 : i64} {
  func.func @_conv_rows_kernel(%arg0: i32, %arg1: i32, %arg2: memref<9x8x4xbf16, #tpu.memory_space<vmem>>, %arg3: memref<8x1xf32, #tpu.memory_space<vmem>>, %arg4: memref<1xf32, #tpu.memory_space<smem>>, %arg5: memref<1x1x4x384xbf16, #tpu.memory_space<vmem>>, %arg6: memref<1x8x16x16xf32, #tpu.memory_space<vmem>>) attributes {dimension_semantics = [#tpu.dimension_semantics<parallel>, #tpu.dimension_semantics<parallel>], iteration_bounds = array<i64: 2, 1>, scalar_prefetch = 0 : i64, scratch_operands = 0 : i64, tpu.core_type = #tpu.core_type<tc>, window_params = [{pipeline_mode = #tpu.pipeline_mode<synchronous>, transform_indices = @transform_0, window_bounds = array<i64: 9, 8, 4>}, {pipeline_mode = #tpu.pipeline_mode<synchronous>, transform_indices = @transform_1, window_bounds = array<i64: 8, 1>}, {transform_indices = @transform_2, window_bounds = array<i64: 1>}, {transform_indices = @transform_3, window_bounds = array<i64: 1, 1, 4, 384>}, {transform_indices = @transform_4, window_bounds = array<i64: 1, 8, 16, 16>}]} {
    %c0 = arith.constant 0 : index
    %c0_0 = arith.constant 0 : index
    %c0_1 = arith.constant 0 : index
    %0 = vector.load %arg2[%c0, %c0_0, %c0_1] : memref<9x8x4xbf16, #tpu.memory_space<vmem>>, vector<9x8x4xbf16>
    %c0_2 = arith.constant 0 : index
    %c0_3 = arith.constant 0 : index
    %c0_4 = arith.constant 0 : index
    %c0_5 = arith.constant 0 : index
    %1 = vector.load %arg5[%c0_2, %c0_3, %c0_4, %c0_5] : memref<1x1x4x384xbf16, #tpu.memory_space<vmem>>, vector<1x1x4x288xbf16>
    %2 = vector.shape_cast %1 : vector<1x1x4x288xbf16> to vector<4x288xbf16>
    %3 = vector.extract_strided_slice %0 {offsets = [0, 0, 0], sizes = [1, 8, 4], strides = [1, 1, 1]} : vector<9x8x4xbf16> to vector<1x8x4xbf16>
    %4 = vector.shape_cast %3 : vector<1x8x4xbf16> to vector<8x4xbf16>
    %cst = arith.constant dense<0.000000e+00> : vector<8x288xf32>
    %5 = tpu.matmul %4, %2, %cst {dimension_numbers = #tpu.dot_dimension_numbers<[1], [0], [0], [1], [0, 0, 1, 1], [], []>} : vector<8x4xbf16>, vector<4x288xbf16>, vector<8x288xf32> -> vector<8x288xf32>
    %c0_6 = arith.constant 0 : index
    %c0_7 = arith.constant 0 : index
    %c0_8 = arith.constant 0 : index
    %c1 = arith.constant 1 : index
    %6 = vector.load %arg5[%c0_6, %c0_7, %c0_8, %c1] : memref<1x1x4x384xbf16, #tpu.memory_space<vmem>>, vector<1x1x4x288xbf16>
    %7 = vector.shape_cast %6 : vector<1x1x4x288xbf16> to vector<4x288xbf16>
    %8 = vector.extract_strided_slice %0 {offsets = [1, 0, 0], sizes = [1, 8, 4], strides = [1, 1, 1]} : vector<9x8x4xbf16> to vector<1x8x4xbf16>
    %9 = vector.shape_cast %8 : vector<1x8x4xbf16> to vector<8x4xbf16>
    %cst_9 = arith.constant dense<0.000000e+00> : vector<8x288xf32>
    %10 = tpu.matmul %9, %7, %cst_9 {dimension_numbers = #tpu.dot_dimension_numbers<[1], [0], [0], [1], [0, 0, 1, 1], [], []>} : vector<8x4xbf16>, vector<4x288xbf16>, vector<8x288xf32> -> vector<8x288xf32>
    %11 = arith.addf %5, %10 : vector<8x288xf32>
    %c0_10 = arith.constant 0 : index
    %c0_11 = arith.constant 0 : index
    %c0_12 = arith.constant 0 : index
    %c2 = arith.constant 2 : index
    %12 = vector.load %arg5[%c0_10, %c0_11, %c0_12, %c2] : memref<1x1x4x384xbf16, #tpu.memory_space<vmem>>, vector<1x1x4x288xbf16>
    %13 = vector.shape_cast %12 : vector<1x1x4x288xbf16> to vector<4x288xbf16>
    %14 = vector.extract_strided_slice %0 {offsets = [2, 0, 0], sizes = [1, 8, 4], strides = [1, 1, 1]} : vector<9x8x4xbf16> to vector<1x8x4xbf16>
    %15 = vector.shape_cast %14 : vector<1x8x4xbf16> to vector<8x4xbf16>
    %cst_13 = arith.constant dense<0.000000e+00> : vector<8x288xf32>
    %16 = tpu.matmul %15, %13, %cst_13 {dimension_numbers = #tpu.dot_dimension_numbers<[1], [0], [0], [1], [0, 0, 1, 1], [], []>} : vector<8x4xbf16>, vector<4x288xbf16>, vector<8x288xf32> -> vector<8x288xf32>
    %17 = arith.addf %11, %16 : vector<8x288xf32>
    %c0_14 = arith.constant 0 : index
    %c0_15 = arith.constant 0 : index
    %c0_16 = arith.constant 0 : index
    %c18 = arith.constant 18 : index
    %18 = vector.load %arg5[%c0_14, %c0_15, %c0_16, %c18] : memref<1x1x4x384xbf16, #tpu.memory_space<vmem>>, vector<1x1x4x288xbf16>
    %19 = vector.shape_cast %18 : vector<1x1x4x288xbf16> to vector<4x288xbf16>
    %20 = vector.extract_strided_slice %0 {offsets = [3, 0, 0], sizes = [1, 8, 4], strides = [1, 1, 1]} : vector<9x8x4xbf16> to vector<1x8x4xbf16>
    %21 = vector.shape_cast %20 : vector<1x8x4xbf16> to vector<8x4xbf16>
    %cst_17 = arith.constant dense<0.000000e+00> : vector<8x288xf32>
    %22 = tpu.matmul %21, %19, %cst_17 {dimension_numbers = #tpu.dot_dimension_numbers<[1], [0], [0], [1], [0, 0, 1, 1], [], []>} : vector<8x4xbf16>, vector<4x288xbf16>, vector<8x288xf32> -> vector<8x288xf32>
    %23 = arith.addf %17, %22 : vector<8x288xf32>
    %c0_18 = arith.constant 0 : index
    %c0_19 = arith.constant 0 : index
    %c0_20 = arith.constant 0 : index
    %c19 = arith.constant 19 : index
    %24 = vector.load %arg5[%c0_18, %c0_19, %c0_20, %c19] : memref<1x1x4x384xbf16, #tpu.memory_space<vmem>>, vector<1x1x4x288xbf16>
    %25 = vector.shape_cast %24 : vector<1x1x4x288xbf16> to vector<4x288xbf16>
    %26 = vector.extract_strided_slice %0 {offsets = [4, 0, 0], sizes = [1, 8, 4], strides = [1, 1, 1]} : vector<9x8x4xbf16> to vector<1x8x4xbf16>
    %27 = vector.shape_cast %26 : vector<1x8x4xbf16> to vector<8x4xbf16>
    %cst_21 = arith.constant dense<0.000000e+00> : vector<8x288xf32>
    %28 = tpu.matmul %27, %25, %cst_21 {dimension_numbers = #tpu.dot_dimension_numbers<[1], [0], [0], [1], [0, 0, 1, 1], [], []>} : vector<8x4xbf16>, vector<4x288xbf16>, vector<8x288xf32> -> vector<8x288xf32>
    %29 = arith.addf %23, %28 : vector<8x288xf32>
    %c0_22 = arith.constant 0 : index
    %c0_23 = arith.constant 0 : index
    %c0_24 = arith.constant 0 : index
    %c20 = arith.constant 20 : index
    %30 = vector.load %arg5[%c0_22, %c0_23, %c0_24, %c20] : memref<1x1x4x384xbf16, #tpu.memory_space<vmem>>, vector<1x1x4x288xbf16>
    %31 = vector.shape_cast %30 : vector<1x1x4x288xbf16> to vector<4x288xbf16>
    %32 = vector.extract_strided_slice %0 {offsets = [5, 0, 0], sizes = [1, 8, 4], strides = [1, 1, 1]} : vector<9x8x4xbf16> to vector<1x8x4xbf16>
    %33 = vector.shape_cast %32 : vector<1x8x4xbf16> to vector<8x4xbf16>
    %cst_25 = arith.constant dense<0.000000e+00> : vector<8x288xf32>
    %34 = tpu.matmul %33, %31, %cst_25 {dimension_numbers = #tpu.dot_dimension_numbers<[1], [0], [0], [1], [0, 0, 1, 1], [], []>} : vector<8x4xbf16>, vector<4x288xbf16>, vector<8x288xf32> -> vector<8x288xf32>
    %35 = arith.addf %29, %34 : vector<8x288xf32>
    %c0_26 = arith.constant 0 : index
    %c0_27 = arith.constant 0 : index
    %c0_28 = arith.constant 0 : index
    %c36 = arith.constant 36 : index
    %36 = vector.load %arg5[%c0_26, %c0_27, %c0_28, %c36] : memref<1x1x4x384xbf16, #tpu.memory_space<vmem>>, vector<1x1x4x288xbf16>
    %37 = vector.shape_cast %36 : vector<1x1x4x288xbf16> to vector<4x288xbf16>
    %38 = vector.extract_strided_slice %0 {offsets = [6, 0, 0], sizes = [1, 8, 4], strides = [1, 1, 1]} : vector<9x8x4xbf16> to vector<1x8x4xbf16>
    %39 = vector.shape_cast %38 : vector<1x8x4xbf16> to vector<8x4xbf16>
    %cst_29 = arith.constant dense<0.000000e+00> : vector<8x288xf32>
    %40 = tpu.matmul %39, %37, %cst_29 {dimension_numbers = #tpu.dot_dimension_numbers<[1], [0], [0], [1], [0, 0, 1, 1], [], []>} : vector<8x4xbf16>, vector<4x288xbf16>, vector<8x288xf32> -> vector<8x288xf32>
    %41 = arith.addf %35, %40 : vector<8x288xf32>
    %c0_30 = arith.constant 0 : index
    %c0_31 = arith.constant 0 : index
    %c0_32 = arith.constant 0 : index
    %c37 = arith.constant 37 : index
    %42 = vector.load %arg5[%c0_30, %c0_31, %c0_32, %c37] : memref<1x1x4x384xbf16, #tpu.memory_space<vmem>>, vector<1x1x4x288xbf16>
    %43 = vector.shape_cast %42 : vector<1x1x4x288xbf16> to vector<4x288xbf16>
    %44 = vector.extract_strided_slice %0 {offsets = [7, 0, 0], sizes = [1, 8, 4], strides = [1, 1, 1]} : vector<9x8x4xbf16> to vector<1x8x4xbf16>
    %45 = vector.shape_cast %44 : vector<1x8x4xbf16> to vector<8x4xbf16>
    %cst_33 = arith.constant dense<0.000000e+00> : vector<8x288xf32>
    %46 = tpu.matmul %45, %43, %cst_33 {dimension_numbers = #tpu.dot_dimension_numbers<[1], [0], [0], [1], [0, 0, 1, 1], [], []>} : vector<8x4xbf16>, vector<4x288xbf16>, vector<8x288xf32> -> vector<8x288xf32>
    %47 = arith.addf %41, %46 : vector<8x288xf32>
    %c0_34 = arith.constant 0 : index
    %c0_35 = arith.constant 0 : index
    %c0_36 = arith.constant 0 : index
    %c38 = arith.constant 38 : index
    %48 = vector.load %arg5[%c0_34, %c0_35, %c0_36, %c38] : memref<1x1x4x384xbf16, #tpu.memory_space<vmem>>, vector<1x1x4x288xbf16>
    %49 = vector.shape_cast %48 : vector<1x1x4x288xbf16> to vector<4x288xbf16>
    %50 = vector.extract_strided_slice %0 {offsets = [8, 0, 0], sizes = [1, 8, 4], strides = [1, 1, 1]} : vector<9x8x4xbf16> to vector<1x8x4xbf16>
    %51 = vector.shape_cast %50 : vector<1x8x4xbf16> to vector<8x4xbf16>
    %cst_37 = arith.constant dense<0.000000e+00> : vector<8x288xf32>
    %52 = tpu.matmul %51, %49, %cst_37 {dimension_numbers = #tpu.dot_dimension_numbers<[1], [0], [0], [1], [0, 0, 1, 1], [], []>} : vector<8x4xbf16>, vector<4x288xbf16>, vector<8x288xf32> -> vector<8x288xf32>
    %53 = arith.addf %47, %52 : vector<8x288xf32>
    %c0_38 = arith.constant 0 : index
    %54 = memref.load %arg4[%c0_38] : memref<1xf32, #tpu.memory_space<smem>>
    %55 = vector.broadcast %54 : f32 to vector<8x288xf32>
    %56 = arith.mulf %53, %55 : vector<8x288xf32>
    %c0_39 = arith.constant 0 : index
    %c0_40 = arith.constant 0 : index
    %57 = vector.load %arg3[%c0_39, %c0_40] : memref<8x1xf32, #tpu.memory_space<vmem>>, vector<8x1xf32>
    %58 = vector.broadcast %57 : vector<8x1xf32> to vector<8x288xf32>
    %59 = arith.addf %56, %58 : vector<8x288xf32>
    %60 = vector.extract_strided_slice %59 {offsets = [0, 0], sizes = [8, 16], strides = [1, 1]} : vector<8x288xf32> to vector<8x16xf32>
    %c0_41 = arith.constant 0 : index
    %c0_42 = arith.constant 0 : index
    %c0_43 = arith.constant 0 : index
    %c0_44 = arith.constant 0 : index
    %61 = vector.load %arg6[%c0_41, %c0_42, %c0_43, %c0_44] : memref<1x8x16x16xf32, #tpu.memory_space<vmem>>, vector<1x8x1x16xf32>
    %62 = vector.shape_cast %61 : vector<1x8x1x16xf32> to vector<8x16xf32>
    %63 = vector.shape_cast %60 : vector<8x16xf32> to vector<1x8x1x16xf32>
    tpu.vector_store %arg6[%c0_41, %c0_42, %c0_43, %c0_44], %63 {strides = array<i32>} : memref<1x8x16x16xf32, #tpu.memory_space<vmem>>, vector<1x8x1x16xf32>,
    %64 = vector.extract_strided_slice %59 {offsets = [0, 18], sizes = [8, 16], strides = [1, 1]} : vector<8x288xf32> to vector<8x16xf32>
    %c0_45 = arith.constant 0 : index
    %c0_46 = arith.constant 0 : index
    %c1_47 = arith.constant 1 : index
    %c0_48 = arith.constant 0 : index
    %65 = vector.load %arg6[%c0_45, %c0_46, %c1_47, %c0_48] : memref<1x8x16x16xf32, #tpu.memory_space<vmem>>, vector<1x8x1x16xf32>
    %66 = vector.shape_cast %65 : vector<1x8x1x16xf32> to vector<8x16xf32>
    %67 = vector.shape_cast %64 : vector<8x16xf32> to vector<1x8x1x16xf32>
    tpu.vector_store %arg6[%c0_45, %c0_46, %c1_47, %c0_48], %67 {strides = array<i32>} : memref<1x8x16x16xf32, #tpu.memory_space<vmem>>, vector<1x8x1x16xf32>,
    %68 = vector.extract_strided_slice %59 {offsets = [0, 36], sizes = [8, 16], strides = [1, 1]} : vector<8x288xf32> to vector<8x16xf32>
    %c0_49 = arith.constant 0 : index
    %c0_50 = arith.constant 0 : index
    %c2_51 = arith.constant 2 : index
    %c0_52 = arith.constant 0 : index
    %69 = vector.load %arg6[%c0_49, %c0_50, %c2_51, %c0_52] : memref<1x8x16x16xf32, #tpu.memory_space<vmem>>, vector<1x8x1x16xf32>
    %70 = vector.shape_cast %69 : vector<1x8x1x16xf32> to vector<8x16xf32>
    %71 = vector.shape_cast %68 : vector<8x16xf32> to vector<1x8x1x16xf32>
    tpu.vector_store %arg6[%c0_49, %c0_50, %c2_51, %c0_52], %71 {strides = array<i32>} : memref<1x8x16x16xf32, #tpu.memory_space<vmem>>, vector<1x8x1x16xf32>,
    %72 = vector.extract_strided_slice %59 {offsets = [0, 54], sizes = [8, 16], strides = [1, 1]} : vector<8x288xf32> to vector<8x16xf32>
    %c0_53 = arith.constant 0 : index
    %c0_54 = arith.constant 0 : index
    %c3 = arith.constant 3 : index
    %c0_55 = arith.constant 0 : index
    %73 = vector.load %arg6[%c0_53, %c0_54, %c3, %c0_55] : memref<1x8x16x16xf32, #tpu.memory_space<vmem>>, vector<1x8x1x16xf32>
    %74 = vector.shape_cast %73 : vector<1x8x1x16xf32> to vector<8x16xf32>
    %75 = vector.shape_cast %72 : vector<8x16xf32> to vector<1x8x1x16xf32>
    tpu.vector_store %arg6[%c0_53, %c0_54, %c3, %c0_55], %75 {strides = array<i32>} : memref<1x8x16x16xf32, #tpu.memory_space<vmem>>, vector<1x8x1x16xf32>,
    %76 = vector.extract_strided_slice %59 {offsets = [0, 72], sizes = [8, 16], strides = [1, 1]} : vector<8x288xf32> to vector<8x16xf32>
    %c0_56 = arith.constant 0 : index
    %c0_57 = arith.constant 0 : index
    %c4 = arith.constant 4 : index
    %c0_58 = arith.constant 0 : index
    %77 = vector.load %arg6[%c0_56, %c0_57, %c4, %c0_58] : memref<1x8x16x16xf32, #tpu.memory_space<vmem>>, vector<1x8x1x16xf32>
    %78 = vector.shape_cast %77 : vector<1x8x1x16xf32> to vector<8x16xf32>
    %79 = vector.shape_cast %76 : vector<8x16xf32> to vector<1x8x1x16xf32>
    tpu.vector_store %arg6[%c0_56, %c0_57, %c4, %c0_58], %79 {strides = array<i32>} : memref<1x8x16x16xf32, #tpu.memory_space<vmem>>, vector<1x8x1x16xf32>,
    %80 = vector.extract_strided_slice %59 {offsets = [0, 90], sizes = [8, 16], strides = [1, 1]} : vector<8x288xf32> to vector<8x16xf32>
    %c0_59 = arith.constant 0 : index
    %c0_60 = arith.constant 0 : index
    %c5 = arith.constant 5 : index
    %c0_61 = arith.constant 0 : index
    %81 = vector.load %arg6[%c0_59, %c0_60, %c5, %c0_61] : memref<1x8x16x16xf32, #tpu.memory_space<vmem>>, vector<1x8x1x16xf32>
    %82 = vector.shape_cast %81 : vector<1x8x1x16xf32> to vector<8x16xf32>
    %83 = vector.shape_cast %80 : vector<8x16xf32> to vector<1x8x1x16xf32>
    tpu.vector_store %arg6[%c0_59, %c0_60, %c5, %c0_61], %83 {strides = array<i32>} : memref<1x8x16x16xf32, #tpu.memory_space<vmem>>, vector<1x8x1x16xf32>,
    %84 = vector.extract_strided_slice %59 {offsets = [0, 108], sizes = [8, 16], strides = [1, 1]} : vector<8x288xf32> to vector<8x16xf32>
    %c0_62 = arith.constant 0 : index
    %c0_63 = arith.constant 0 : index
    %c6 = arith.constant 6 : index
    %c0_64 = arith.constant 0 : index
    %85 = vector.load %arg6[%c0_62, %c0_63, %c6, %c0_64] : memref<1x8x16x16xf32, #tpu.memory_space<vmem>>, vector<1x8x1x16xf32>
    %86 = vector.shape_cast %85 : vector<1x8x1x16xf32> to vector<8x16xf32>
    %87 = vector.shape_cast %84 : vector<8x16xf32> to vector<1x8x1x16xf32>
    tpu.vector_store %arg6[%c0_62, %c0_63, %c6, %c0_64], %87 {strides = array<i32>} : memref<1x8x16x16xf32, #tpu.memory_space<vmem>>, vector<1x8x1x16xf32>,
    %88 = vector.extract_strided_slice %59 {offsets = [0, 126], sizes = [8, 16], strides = [1, 1]} : vector<8x288xf32> to vector<8x16xf32>
    %c0_65 = arith.constant 0 : index
    %c0_66 = arith.constant 0 : index
    %c7 = arith.constant 7 : index
    %c0_67 = arith.constant 0 : index
    %89 = vector.load %arg6[%c0_65, %c0_66, %c7, %c0_67] : memref<1x8x16x16xf32, #tpu.memory_space<vmem>>, vector<1x8x1x16xf32>
    %90 = vector.shape_cast %89 : vector<1x8x1x16xf32> to vector<8x16xf32>
    %91 = vector.shape_cast %88 : vector<8x16xf32> to vector<1x8x1x16xf32>
    tpu.vector_store %arg6[%c0_65, %c0_66, %c7, %c0_67], %91 {strides = array<i32>} : memref<1x8x16x16xf32, #tpu.memory_space<vmem>>, vector<1x8x1x16xf32>,
    %92 = vector.extract_strided_slice %59 {offsets = [0, 144], sizes = [8, 16], strides = [1, 1]} : vector<8x288xf32> to vector<8x16xf32>
    %c0_68 = arith.constant 0 : index
    %c0_69 = arith.constant 0 : index
    %c8 = arith.constant 8 : index
    %c0_70 = arith.constant 0 : index
    %93 = vector.load %arg6[%c0_68, %c0_69, %c8, %c0_70] : memref<1x8x16x16xf32, #tpu.memory_space<vmem>>, vector<1x8x1x16xf32>
    %94 = vector.shape_cast %93 : vector<1x8x1x16xf32> to vector<8x16xf32>
    %95 = vector.shape_cast %92 : vector<8x16xf32> to vector<1x8x1x16xf32>
    tpu.vector_store %arg6[%c0_68, %c0_69, %c8, %c0_70], %95 {strides = array<i32>} : memref<1x8x16x16xf32, #tpu.memory_space<vmem>>, vector<1x8x1x16xf32>,
    %96 = vector.extract_strided_slice %59 {offsets = [0, 162], sizes = [8, 16], strides = [1, 1]} : vector<8x288xf32> to vector<8x16xf32>
    %c0_71 = arith.constant 0 : index
    %c0_72 = arith.constant 0 : index
    %c9 = arith.constant 9 : index
    %c0_73 = arith.constant 0 : index
    %97 = vector.load %arg6[%c0_71, %c0_72, %c9, %c0_73] : memref<1x8x16x16xf32, #tpu.memory_space<vmem>>, vector<1x8x1x16xf32>
    %98 = vector.shape_cast %97 : vector<1x8x1x16xf32> to vector<8x16xf32>
    %99 = vector.shape_cast %96 : vector<8x16xf32> to vector<1x8x1x16xf32>
    tpu.vector_store %arg6[%c0_71, %c0_72, %c9, %c0_73], %99 {strides = array<i32>} : memref<1x8x16x16xf32, #tpu.memory_space<vmem>>, vector<1x8x1x16xf32>,
    %100 = vector.extract_strided_slice %59 {offsets = [0, 180], sizes = [8, 16], strides = [1, 1]} : vector<8x288xf32> to vector<8x16xf32>
    %c0_74 = arith.constant 0 : index
    %c0_75 = arith.constant 0 : index
    %c10 = arith.constant 10 : index
    %c0_76 = arith.constant 0 : index
    %101 = vector.load %arg6[%c0_74, %c0_75, %c10, %c0_76] : memref<1x8x16x16xf32, #tpu.memory_space<vmem>>, vector<1x8x1x16xf32>
    %102 = vector.shape_cast %101 : vector<1x8x1x16xf32> to vector<8x16xf32>
    %103 = vector.shape_cast %100 : vector<8x16xf32> to vector<1x8x1x16xf32>
    tpu.vector_store %arg6[%c0_74, %c0_75, %c10, %c0_76], %103 {strides = array<i32>} : memref<1x8x16x16xf32, #tpu.memory_space<vmem>>, vector<1x8x1x16xf32>,
    %104 = vector.extract_strided_slice %59 {offsets = [0, 198], sizes = [8, 16], strides = [1, 1]} : vector<8x288xf32> to vector<8x16xf32>
    %c0_77 = arith.constant 0 : index
    %c0_78 = arith.constant 0 : index
    %c11 = arith.constant 11 : index
    %c0_79 = arith.constant 0 : index
    %105 = vector.load %arg6[%c0_77, %c0_78, %c11, %c0_79] : memref<1x8x16x16xf32, #tpu.memory_space<vmem>>, vector<1x8x1x16xf32>
    %106 = vector.shape_cast %105 : vector<1x8x1x16xf32> to vector<8x16xf32>
    %107 = vector.shape_cast %104 : vector<8x16xf32> to vector<1x8x1x16xf32>
    tpu.vector_store %arg6[%c0_77, %c0_78, %c11, %c0_79], %107 {strides = array<i32>} : memref<1x8x16x16xf32, #tpu.memory_space<vmem>>, vector<1x8x1x16xf32>,
    %108 = vector.extract_strided_slice %59 {offsets = [0, 216], sizes = [8, 16], strides = [1, 1]} : vector<8x288xf32> to vector<8x16xf32>
    %c0_80 = arith.constant 0 : index
    %c0_81 = arith.constant 0 : index
    %c12 = arith.constant 12 : index
    %c0_82 = arith.constant 0 : index
    %109 = vector.load %arg6[%c0_80, %c0_81, %c12, %c0_82] : memref<1x8x16x16xf32, #tpu.memory_space<vmem>>, vector<1x8x1x16xf32>
    %110 = vector.shape_cast %109 : vector<1x8x1x16xf32> to vector<8x16xf32>
    %111 = vector.shape_cast %108 : vector<8x16xf32> to vector<1x8x1x16xf32>
    tpu.vector_store %arg6[%c0_80, %c0_81, %c12, %c0_82], %111 {strides = array<i32>} : memref<1x8x16x16xf32, #tpu.memory_space<vmem>>, vector<1x8x1x16xf32>,
    %112 = vector.extract_strided_slice %59 {offsets = [0, 234], sizes = [8, 16], strides = [1, 1]} : vector<8x288xf32> to vector<8x16xf32>
    %c0_83 = arith.constant 0 : index
    %c0_84 = arith.constant 0 : index
    %c13 = arith.constant 13 : index
    %c0_85 = arith.constant 0 : index
    %113 = vector.load %arg6[%c0_83, %c0_84, %c13, %c0_85] : memref<1x8x16x16xf32, #tpu.memory_space<vmem>>, vector<1x8x1x16xf32>
    %114 = vector.shape_cast %113 : vector<1x8x1x16xf32> to vector<8x16xf32>
    %115 = vector.shape_cast %112 : vector<8x16xf32> to vector<1x8x1x16xf32>
    tpu.vector_store %arg6[%c0_83, %c0_84, %c13, %c0_85], %115 {strides = array<i32>} : memref<1x8x16x16xf32, #tpu.memory_space<vmem>>, vector<1x8x1x16xf32>,
    %116 = vector.extract_strided_slice %59 {offsets = [0, 252], sizes = [8, 16], strides = [1, 1]} : vector<8x288xf32> to vector<8x16xf32>
    %c0_86 = arith.constant 0 : index
    %c0_87 = arith.constant 0 : index
    %c14 = arith.constant 14 : index
    %c0_88 = arith.constant 0 : index
    %117 = vector.load %arg6[%c0_86, %c0_87, %c14, %c0_88] : memref<1x8x16x16xf32, #tpu.memory_space<vmem>>, vector<1x8x1x16xf32>
    %118 = vector.shape_cast %117 : vector<1x8x1x16xf32> to vector<8x16xf32>
    %119 = vector.shape_cast %116 : vector<8x16xf32> to vector<1x8x1x16xf32>
    tpu.vector_store %arg6[%c0_86, %c0_87, %c14, %c0_88], %119 {strides = array<i32>} : memref<1x8x16x16xf32, #tpu.memory_space<vmem>>, vector<1x8x1x16xf32>,
    %120 = vector.extract_strided_slice %59 {offsets = [0, 270], sizes = [8, 16], strides = [1, 1]} : vector<8x288xf32> to vector<8x16xf32>
    %c0_89 = arith.constant 0 : index
    %c0_90 = arith.constant 0 : index
    %c15 = arith.constant 15 : index
    %c0_91 = arith.constant 0 : index
    %121 = vector.load %arg6[%c0_89, %c0_90, %c15, %c0_91] : memref<1x8x16x16xf32, #tpu.memory_space<vmem>>, vector<1x8x1x16xf32>
    %122 = vector.shape_cast %121 : vector<1x8x1x16xf32> to vector<8x16xf32>
    %123 = vector.shape_cast %120 : vector<8x16xf32> to vector<1x8x1x16xf32>
    tpu.vector_store %arg6[%c0_89, %c0_90, %c15, %c0_91], %123 {strides = array<i32>} : memref<1x8x16x16xf32, #tpu.memory_space<vmem>>, vector<1x8x1x16xf32>,
    return
  }
  func.func @transform_0(%arg0: i32, %arg1: i32) -> (i32, i32, i32) {
    %c0_i32 = arith.constant 0 : i32
    %c0_i32_0 = arith.constant 0 : i32
    %c0_i32_1 = arith.constant 0 : i32
    %c0_i32_2 = arith.constant 0 : i32
    return %c0_i32, %c0_i32_0, %c0_i32_1 : i32, i32, i32
  }
  func.func @transform_1(%arg0: i32, %arg1: i32) -> (i32, i32) {
    %c0_i32 = arith.constant 0 : i32
    %c0_i32_0 = arith.constant 0 : i32
    %c0_i32_1 = arith.constant 0 : i32
    return %c0_i32, %c0_i32_0 : i32, i32
  }
  func.func @transform_2(%arg0: i32, %arg1: i32) -> i32 {
    %c0_i32 = arith.constant 0 : i32
    %c0_i32_0 = arith.constant 0 : i32
    return %c0_i32 : i32
  }
  func.func @transform_3(%arg0: i32, %arg1: i32) -> (i32, i32, i32, i32) {
    %c0_i32 = arith.constant 0 : i32
    %c0_i32_0 = arith.constant 0 : i32
    %c0_i32_1 = arith.constant 0 : i32
    return %arg0, %arg1, %c0_i32, %c0_i32_0 : i32, i32, i32, i32
  }
  func.func @transform_4(%arg0: i32, %arg1: i32) -> (i32, i32, i32, i32) {
    %c0_i32 = arith.constant 0 : i32
    %c0_i32_0 = arith.constant 0 : i32
    %c0_i32_1 = arith.constant 0 : i32
    return %arg0, %c0_i32, %arg1, %c0_i32_0 : i32, i32, i32, i32
  }
}

</mosaic_0001>

<bundles_post_ra>
// kernel: conv2d_block_forward.1
= control target key start
LH: loop header
LB: loop body
LE: loop exit
PB: predicated region body
PF: predicated region fallthrough
CT: control target
= control target key end

     0   :  { %s4004_s0 = inlined_call_operand.vmem [shape: bf16[9,8,4], index: 0, kind: input, shape index: {}]   ;;  %s4005_s1 = inlined_call_operand.vmem [shape: f32[8,1], index: 1, kind: input, shape index: {}]   ;;  %s4006_s2 = inlined_call_operand.<no memory space> [shape: f32[1], index: 2, kind: input, shape index: {}]   ;;  %s4007_s3 = inlined_call_operand.vmem [shape: bf16[2,1,4,384], index: 3, kind: input, shape index: {}]   ;;  %s4008_s4 = inlined_call_operand.hbm [shape: f32[2,8,16,16], index: 4, kind: output, shape index: {}]  }
   0x1   :  { %9 = sst [smem:[#allocation2]] %s4006_s2 }
   0x2   :  { %10 = vsyncpa [#allocation4], 0 }
   0x3   :  { %12 = vsyncpa [#allocation4 + $0x1], 0  ;;  %s2850_s17 = smov 0   ;;  %s2852_s18 = smov 0  }
   0x4   :  { %s2854_s19 = smov 0   ;;  %s2856_s20 = smov 0  }
   0x5   :  { %s2858_s21 = smov 0   ;;  %s2860_s22 = smov 0  }
   0x6 LB: > { %s2444_s2 = sadd.s32 4294967295, %s2791_s22   ;;  %s2445_s23 = sadd.s32 4294967294, %s2791_s22   ;;  %s2791_s22 = sphi %s2860_s22, %s18_s22   ;;  %s2787_s21 = sphi %s2858_s21, %s4022_s21   ;;  %s2783_s20 = sphi %s2856_s20, %s4021_s20   ;;  %s2779_s19 = sphi %s2854_s19, %s4020_s19   ;;  %s2775_s18 = sphi %s2852_s18, %s4019_s18   ;;  %s2771_s17 = sphi %s2850_s17, %s4018_s17  }
   0x7   : > { %s30_s24 = sadd.s32 1, %s2787_s21  ;;  %s130_s25 = sadd.s32 1, %s2779_s19 }
   0x8   : > { %p32_p0 = scmp.ge.s32.totalorder %s30_s24, 2  ;;  %p140_p1 = scmp.ne.s32.totalorder %s2779_s19, %s2775_s18 }
   0x9   : > { %p141_p2 = scmp.eq.s32.totalorder %s2444_s2, 1  ;;  %p146_p3 = scmp.ne.s32.totalorder %s2775_s18, %s2771_s17 }
   0xa   : > { %s4024_s24 = smov (%p32_p0, %s30_s24), 0  ;;  %p147_p5 = scmp.eq.s32.totalorder %s2445_s23, 1 }
   0xb   : > { %p2890_p4 = por %p141_p2, %p140_p1  ;;  %s125_s27 = ssub.s32 %s2787_s21, %s4024_s24 }
   0xc   : > { %p2448_p6 = scmp.ge.s32.totalorder %s2791_s22, 1  ;;  %p128_p7 = scmp.eq.s32.totalorder %s125_s27, 0 }
   0xd   : > { %p2897_p8 = por %p147_p5, %p146_p3  ;;  %p186_p9 = scmp.lt.s32.totalorder %s2791_s22, 3 }
   0xe   : > { %s2903_s29 = scalar_select %p128_p7, %s2779_s19, %s130_s25  }
   0xf   : > { %p187_p10 = pnand %p2448_p6, %p186_p9 }
  0x10   : > { %p216_p11 = scmp.lt.s32.totalorder (!%p187_p10), %s2783_s20, 1  ;;  %v242_v0 = vlaneseq (!%p187_p10)  ;;  %v2793_v1 = vmov (!%p187_p10), 1983009808   ;;  %v2794_v4 = vmov (!%p187_p10), 0.0   ;;  %vm2795_vm0 = vmmov (!%p187_p10), 0   ;;  %s2797_s9 = smov (!%p187_p10), 127  }
  0x11   : > { %190 = sbr.rel (%p187_p10) target bundleno = 877 (0x36d), region = 36  ;;  %v240_v2 = vunpack.c.l.s4 (!%p187_p10), %v2793_v1  ;;  %2502 = vmatprep.subr.bf16.mxu1 (!%p187_p10), %v2794_v4  ;;  %2504 = vmatprep.mubr.msk.bf16.mxu1 (!%p187_p10), %vm2795_vm0, %v2794_v4  ;;  %v2796_v6 = vmov (!%p187_p10), 0   ;;  %s2798_s10 = smov (!%p187_p10), 126   ;;  %v1317_v48 = vld [vmem:[%s4005_s1] sm:$0xff] (!%p187_p10)  ;;  %vm267_vm1 = vcmask (!%p187_p10), 1041408   ;;  %vm260_vm2 = vcmask (!%p187_p10), 1039360  }
  0x12   : > { %v2907_v3 = vshrl.u32 (!%p187_p10), %v242_v0, 7  ;;  %309 = vmatprep.mubr.bf16.mxu0 (!%p187_p10), %v2796_v6  ;;  %2704 = vset.pattern.permute.xlu0 (!%p187_p10), %v2796_v6  ;;  %s2799_s11 = smov (!%p187_p10), 110   ;;  %s2800_s12 = smov (!%p187_p10), 109   ;;  %v228_v53 = vld [vmem:[%s4004_s0 + $0x4] sm:$0xf] (!%p187_p10)  ;;  %vm263_vm3 = vcmask (!%p187_p10), 31744  }
  0x13   : > { %v241_v5 = vunpack.c.0.s8 (!%p187_p10), %v240_v2  ;;  %s2801_s13 = smov (!%p187_p10), 108   ;;  %s2802_s14 = smov (!%p187_p10), 92   ;;  %vm475_vm4 = vcmask (!%p187_p10), 1031168   ;;  %v227_v0 = vld [vmem:[%s4004_s0] sm:$0xf] (!%p187_p10)  ;;  %vm598_vm5 = vcmask (!%p187_p10), 900096  }
  0x14   : > { %s2803_s15 = smov (!%p187_p10), 91   ;;  %s2804_s16 = smov (!%p187_p10), 90   ;;  %vm721_vm6 = vcmask (!%p187_p10), 891904   ;;  %vm844_vm7 = vcmask (!%p187_p10), 883712   ;;  %vm967_vm8 = vcmask (!%p187_p10), 752640   ;;  %vm1090_vm9 = vcmask (!%p187_p10), 744448  }
  0x15   : > { %v2915_v7 = vsub.s32 (!%p187_p10), %v241_v5, %v2907_v3  ;;  %vm1213_vm10 = vcmask (!%p187_p10), 736256   ;;  %s213_s6 = sand.u32 (!%p187_p10), 1, %s2775_s18   ;;  %vm1384_vm11 = vcmask (!%p187_p10), 122880   ;;  %s2812_s2 = smov (!%p187_p10), 94   ;;  %vm1764_vm12 = vcmask (!%p187_p10), 15360  }
  0x16   : > { %s2449_s7 = sshll.u32 (!%p187_p10), %s213_s6, 7  ;;  %s2813_s23 = smov (!%p187_p10), 76  }
  0x17   : > { %s2814_s25 = smov (!%p187_p10), 2   ;;  %s2815_s27 = smov (!%p187_p10), 58  }
  0x18   : > { %s217_s30 = scalar_select %p216_p11, %s2783_s20, 1 }
  0x1a   : > { %s2620_s5 = smul.u32 6, %s217_s30  ;;  %s2816_s30 = smov 40  }
  0x1c   : > { %s2920_s8 = scalar_lea.vmem %s4007_s3, %s2620_s5  ;;  %s1312_s5 = sld [smem:[#allocation2]] }
  0x1d   : > { %v236_v8 = vld [vmem:[%s2920_s8] sm:$0x3f] }
  0x1e   : > { %v2924_v9 = vrot.slane %v236_v8, %v2915_v7  ;;  %v238_v10 = vcombine.high %v236_v8, %v236_v8  ;;  %v451_v11 = vld [vmem:[%s2920_s8] sm:$0x3f] }
  0x1f   : > { %v460_v14 = vrot.slane %v451_v11, %v2915_v7  ;;  %v453_v15 = vcombine.high %v451_v11, %v451_v11  ;;  %v574_v17 = vld [vmem:[%s2920_s8] sm:$0x3f]  ;;  %v229_v11 = vld [vmem:[%s4004_s0 + $0x8] sm:$0xf] }
  0x20   : > { %254 = vrot.lane.b32.xlu0 %v2924_v9, %s2797_s9  ;;  %v2929_v12 = vrot.slane %v238_v10, %v2915_v7  ;;  %v2933_v13 = vcombine.high %v2924_v9, %v2924_v9  ;;  %v583_v19 = vrot.slane %v574_v17, %v2915_v7  ;;  %v576_v20 = vcombine.high %v574_v17, %v574_v17  ;;  %v697_v22 = vld [vmem:[%s2920_s8] sm:$0x3f] }
  0x21   : > { %v468_v16 = vcombine.high %v460_v14, %v460_v14  ;;  %v467_v18 = vrot.slane %v453_v15, %v2915_v7  ;;  %v706_v24 = vrot.slane %v697_v22, %v2915_v7  ;;  %v699_v25 = vcombine.high %v697_v22, %v697_v22  ;;  %v820_v27 = vld [vmem:[%s2920_s8] sm:$0x3f] }
  0x22   : > { %258 = vrot.lane.b32.xlu1 %v2929_v12, %s2797_s9  ;;  %v591_v21 = vcombine.high %v583_v19, %v583_v19  ;;  %v590_v23 = vrot.slane %v576_v20, %v2915_v7  ;;  %v829_v29 = vrot.slane %v820_v27, %v2915_v7  ;;  %v822_v30 = vcombine.high %v820_v27, %v820_v27  ;;  %v943_v32 = vld [vmem:[%s2920_s8] sm:$0x3f]  ;;  %v231_v27 = vld [vmem:[%s4004_s0 + $0x10] sm:$0xf] }
  0x23   : > { %v714_v26 = vcombine.high %v706_v24, %v706_v24  ;;  %v713_v28 = vrot.slane %v699_v25, %v2915_v7  ;;  %v952_v34 = vrot.slane %v943_v32, %v2915_v7  ;;  %v945_v35 = vcombine.high %v943_v32, %v943_v32  ;;  %v1066_v37 = vld [vmem:[%s2920_s8] sm:$0x3f] }
  0x24   : > { %256 = vrot.lane.b32.xlu0 %v2933_v13, %s2797_s9  ;;  %v837_v31 = vcombine.high %v829_v29, %v829_v29  ;;  %v836_v33 = vrot.slane %v822_v30, %v2915_v7  ;;  %v1075_v39 = vrot.slane %v1066_v37, %v2915_v7  ;;  %v1068_v40 = vcombine.high %v1066_v37, %v1066_v37  ;;  %v1189_v42 = vld [vmem:[%s2920_s8] sm:$0x3f]  ;;  %s2806_s8 = smov 114   ;;  %s3110_s9 = scalar_lea.vmem [#allocation3], %s2449_s7 }
  0x25   : > { %v960_v36 = vcombine.high %v952_v34, %v952_v34  ;;  %v959_v38 = vrot.slane %v945_v35, %v2915_v7  ;;  %v1198_v44 = vrot.slane %v1189_v42, %v2915_v7  ;;  %v1191_v45 = vcombine.high %v1189_v42, %v1189_v42  ;;  %v232_v35 = vld [vmem:[%s4004_s0 + $0x14] sm:$0xf]  ;;  %s2818_s7 = smov 4  }
  0x26   : > { %469 = vrot.lane.b32.xlu1 %v460_v14, %s2798_s10  ;;  %v1083_v41 = vcombine.high %v1075_v39, %v1075_v39  ;;  %v1082_v43 = vrot.slane %v1068_v40, %v2915_v7  ;;  %v368_v56 = vsel %vm267_vm1, %v2929_v12, 0  ;;  %v362_v59 = vsel %vm267_vm1, %v2924_v9, 0 }
  0x27   : > { %v1206_v46 = vcombine.high %v1198_v44, %v1198_v44  ;;  %v1205_v47 = vrot.slane %v1191_v45, %v2915_v7 }
  0x28   : > { %471 = vrot.lane.b32.xlu0 %v468_v16, %s2798_s10 }
  0x2a   : > { %473 = vrot.lane.b32.xlu1 %v467_v18, %s2798_s10  ;;  %s2807_s10 = smov 74  }
  0x2c   : > { %592 = vrot.lane.b32.xlu0 %v583_v19, %s2799_s11  ;;  %v230_v19 = vld [vmem:[%s4004_s0 + $0xc] sm:$0xf] }
  0x2e   : > { %594 = vrot.lane.b32.xlu1 %v591_v21, %s2799_s11 }
  0x30   : > { %596 = vrot.lane.b32.xlu0 %v590_v23, %s2799_s11 }
  0x32   : > { %715 = vrot.lane.b32.xlu1 %v706_v24, %s2800_s12 }
  0x34   : > { %717 = vrot.lane.b32.xlu0 %v714_v26, %s2800_s12 }
  0x36   : > { %719 = vrot.lane.b32.xlu1 %v713_v28, %s2800_s12  ;;  %s2808_s12 = smov 56  }
  0x38   : > { %838 = vrot.lane.b32.xlu0 %v829_v29, %s2801_s13 }
  0x3a   : > { %840 = vrot.lane.b32.xlu1 %v837_v31, %s2801_s13 }
  0x3c   : > { %842 = vrot.lane.b32.xlu0 %v836_v33, %s2801_s13  ;;  %s2809_s13 = smov 38  }
  0x3e   : > { %961 = vrot.lane.b32.xlu1 %v952_v34, %s2802_s14 }
  0x40   : > { %963 = vrot.lane.b32.xlu0 %v960_v36, %s2802_s14 }
  0x42   : > { %965 = vrot.lane.b32.xlu1 %v959_v38, %s2802_s14 }
  0x44   : > { %1084 = vrot.lane.b32.xlu0 %v1075_v39, %s2803_s15 }
  0x46   : > { %1086 = vrot.lane.b32.xlu1 %v1083_v41, %s2803_s15 }
  0x48   : > { %1088 = vrot.lane.b32.xlu0 %v1082_v43, %s2803_s15  ;;  %v233_v43 = vld [vmem:[%s4004_s0 + $0x18] sm:$0xf]  ;;  %s2810_s15 = smov 20  }
  0x4a   : > { %1207 = vrot.lane.b32.xlu1 %v1198_v44, %s2804_s16 }
  0x4c   : > { %1209 = vrot.lane.b32.xlu0 %v1206_v46, %s2804_s16 }
  0x4e   : > { %1211 = vrot.lane.b32.xlu1 %v1205_v47, %s2804_s16  ;;  %s2811_s16 = smov 112  }
  0x50   : > { %1320 = vperm.xlu0 %2704, %v1317_v48  }
  0x92   : > { %v255_v49 = vpop.permute.xlu0 %254 }
  0x94   : > { %v259_v50 = vpop.permute.xlu1 %258 }
  0x95   : > { %v275_v51 = vsel %vm267_vm1, %v259_v50, 0 }
  0x96   : > { %v257_v52 = vpop.permute.xlu0 %256  ;;  %2503 = vmatpush3.bf16.msra.mxu1 %v275_v51 }
  0x97   : > { %v262_v54 = vsel %vm260_vm2, %v257_v52, %v259_v50  ;;  %v261_v55 = vsel %vm260_vm2, %v255_v49, %v257_v52  ;;  %2508 = vmatprep.subr.bf16.mxu1 %v2794_v4  ;;  %v234_v50 = vld [vmem:[%s4004_s0 + $0x1c] sm:$0xf] }
  0x98   : > { %2451 = vmatprep.subr.msk.bf16.mxu0 %vm267_vm1, %v262_v54  ;;  %v269_v57 = vsel %vm267_vm1, %v261_v55, 0  ;;  %v470_v58 = vpop.permute.xlu1 %469  ;;  %v235_v54 = vld [vmem:[%s4004_s0 + $0x20] sm:$0xf]  ;;  %v2805_v55 = vmov 1966171168  }
  0x99   : > { %278 = vmatpush1.bf16.msra.mxu0 %v269_v57  ;;  %2505 = vmatmul.mubr.msk.bf16.vlgmr.msra.gmra.mrb[0].mxu1 %vm263_vm3, %v228_v53 }
  0x9a   : > { %2454 = vmatprep.subr.msk.bf16.mxu0 %vm267_vm1, %v2933_v13  ;;  %2509 = vmatpush3.bf16.msra.mxu1 %v368_v56  ;;  %v472_v60 = vpop.permute.xlu0 %471  ;;  %v1329_v56 = vunpack.c.l.s4 %v2805_v55 }
  0x9b   : > { %2510 = vmatprep.mubr.msk.bf16.mxu1 %vm2795_vm0, %v2794_v4  ;;  %2514 = vmatprep.subr.bf16.mxu1 %v2794_v4  ;;  %v476_v1 = vsel %vm475_vm4, %v470_v58, %v472_v60  ;;  %v1313_v58 = vstv %s1312_s5  ;;  %s2817_s5 = smov 22  }
  0x9c   : > { %2452 = vmatmul.mubr.msk.bf16.vlgmr.msra.gmra.mrb[0].mxu0 %vm263_vm3, %v228_v53  ;;  %v474_v61 = vpop.permute.xlu1 %473  ;;  %v482_v8 = vsel %vm267_vm1, %v476_v1, 0  ;;  %v1330_v57 = vunpack.c.0.s8 %v1329_v56 }
  0x9d   : > { %371 = vmatpush1.bf16.msra.mxu0 %v362_v59  ;;  %402 = vmatprep.mubr.bf16.mxu0 %v2796_v6  ;;  %v477_v62 = vsel %vm475_vm4, %v472_v60, %v474_v61  ;;  %v488_v2 = vsel %vm267_vm1, %v474_v61, 0 }
  0x9e   : > { %2457 = vmatprep.subr.msk.bf16.mxu0 %vm267_vm1, %v477_v62  ;;  %v593_v63 = vpop.permute.xlu0 %592  ;;  %v3074_v60 = vsub.s32 %v1330_v57, %v2907_v3 }
  0xa0   : > { %v595_v5 = vpop.permute.xlu1 %594 }
  0xa1   : > { %v599_v12 = vsel %vm598_vm5, %v593_v63, %v595_v5 }
  0xa2   : > { %v597_v7 = vpop.permute.xlu0 %596  ;;  %v605_v16 = vsel %vm267_vm1, %v599_v12, 0 }
  0xa3   : > { %v600_v9 = vsel %vm598_vm5, %v595_v5, %v597_v7  ;;  %v611_v13 = vsel %vm267_vm1, %v597_v7, 0  ;;  %v3080_v7 = vsub.s32 0, %v2907_v3 }
  0xa4   : > { %v716_v10 = vpop.permute.xlu1 %715 }
  0xa5   : > { %2511 = vmatmul.mubr.msk.bf16.vlgmr.msra.gmra.mrb[0].mxu1 %vm263_vm3, %v227_v0 }
  0xa6   : > { %2515 = vmatpush3.bf16.msra.mxu1 %v488_v2  ;;  %2516 = vmatprep.mubr.msk.bf16.mxu1 %vm2795_vm0, %v2794_v4  ;;  %v718_v14 = vpop.permute.xlu0 %717 }
  0xa7   : > { %2520 = vmatprep.subr.bf16.mxu1 %v2794_v4  ;;  %v722_v20 = vsel %vm721_vm6, %v716_v10, %v718_v14 }
  0xa8   : > { %2455 = vmatmul.mubr.msk.bf16.vlgmr.msra.gmra.mrb[0].mxu0 %vm263_vm3, %v227_v0  ;;  %v720_v15 = vpop.permute.xlu1 %719  ;;  %v728_v24 = vsel %vm267_vm1, %v722_v20, 0 }
  0xa9   : > { %491 = vmatpush1.bf16.msra.mxu0 %v482_v8  ;;  %522 = vmatprep.mubr.bf16.mxu0 %v2796_v6  ;;  %v723_v17 = vsel %vm721_vm6, %v718_v14, %v720_v15  ;;  %v734_v21 = vsel %vm267_vm1, %v720_v15, 0 }
  0xaa   : > { %2460 = vmatprep.subr.msk.bf16.mxu0 %vm267_vm1, %v600_v9  ;;  %v839_v18 = vpop.permute.xlu0 %838 }
  0xac   : > { %v841_v22 = vpop.permute.xlu1 %840 }
  0xad   : > { %v845_v28 = vsel %vm844_vm7, %v839_v18, %v841_v22 }
  0xae   : > { %v843_v23 = vpop.permute.xlu0 %842  ;;  %v851_v32 = vsel %vm267_vm1, %v845_v28, 0 }
  0xaf   : > { %v846_v25 = vsel %vm844_vm7, %v841_v22, %v843_v23  ;;  %v857_v29 = vsel %vm267_vm1, %v843_v23, 0 }
  0xb0   : > { %v962_v26 = vpop.permute.xlu1 %961 }
  0xb1   : > { %2517 = vmatmul.mubr.msk.bf16.vlgmr.msra.gmra.mrb[0].mxu1 %vm263_vm3, %v229_v11 }
  0xb2   : > { %2521 = vmatpush3.bf16.msra.mxu1 %v611_v13  ;;  %2522 = vmatprep.mubr.msk.bf16.mxu1 %vm2795_vm0, %v2794_v4  ;;  %v964_v30 = vpop.permute.xlu0 %963 }
  0xb3   : > { %2526 = vmatprep.subr.bf16.mxu1 %v2794_v4  ;;  %v968_v36 = vsel %vm967_vm8, %v962_v26, %v964_v30 }
  0xb4   : > { %2458 = vmatmul.mubr.msk.bf16.vlgmr.msra.gmra.mrb[0].mxu0 %vm263_vm3, %v229_v11  ;;  %v966_v31 = vpop.permute.xlu1 %965  ;;  %v974_v40 = vsel %vm267_vm1, %v968_v36, 0 }
  0xb5   : > { %614 = vmatpush1.bf16.msra.mxu0 %v605_v16  ;;  %645 = vmatprep.mubr.bf16.mxu0 %v2796_v6  ;;  %v969_v33 = vsel %vm967_vm8, %v964_v30, %v966_v31  ;;  %v980_v37 = vsel %vm267_vm1, %v966_v31, 0 }
  0xb6   : > { %2463 = vmatprep.subr.msk.bf16.mxu0 %vm267_vm1, %v723_v17  ;;  %v1085_v34 = vpop.permute.xlu0 %1084 }
  0xb8   : > { %v1087_v38 = vpop.permute.xlu1 %1086 }
  0xb9   : > { %v1091_v44 = vsel %vm1090_vm9, %v1085_v34, %v1087_v38 }
  0xba   : > { %v1089_v39 = vpop.permute.xlu0 %1088  ;;  %v1097_v48 = vsel %vm267_vm1, %v1091_v44, 0 }
  0xbb   : > { %v1092_v41 = vsel %vm1090_vm9, %v1087_v38, %v1089_v39  ;;  %v1103_v45 = vsel %vm267_vm1, %v1089_v39, 0 }
  0xbc   : > { %v1208_v42 = vpop.permute.xlu1 %1207 }
  0xbd   : > { %2523 = vmatmul.mubr.msk.bf16.vlgmr.msra.gmra.mrb[0].mxu1 %vm263_vm3, %v230_v19 }
  0xbe   : > { %2527 = vmatpush3.bf16.msra.mxu1 %v734_v21  ;;  %2528 = vmatprep.mubr.msk.bf16.mxu1 %vm2795_vm0, %v2794_v4  ;;  %v1210_v46 = vpop.permute.xlu0 %1209 }
  0xbf   : > { %2532 = vmatprep.subr.bf16.mxu1 %v2794_v4  ;;  %v1214_v51 = vsel %vm1213_vm10, %v1208_v42, %v1210_v46 }
  0xc0   : > { %2461 = vmatmul.mubr.msk.bf16.vlgmr.msra.gmra.mrb[0].mxu0 %vm263_vm3, %v230_v19  ;;  %v1212_v47 = vpop.permute.xlu1 %1211  ;;  %v1220_v53 = vsel %vm267_vm1, %v1214_v51, 0 }
  0xc1   : > { %737 = vmatpush1.bf16.msra.mxu0 %v728_v24  ;;  %768 = vmatprep.mubr.bf16.mxu0 %v2796_v6  ;;  %v1215_v49 = vsel %vm1213_vm10, %v1210_v46, %v1212_v47  ;;  %v1226_v52 = vsel %vm267_vm1, %v1212_v47, 0 }
  0xc2   : > { %2466 = vmatprep.subr.msk.bf16.mxu0 %vm267_vm1, %v846_v25 }
  0xc9   : > { %2529 = vmatmul.mubr.msk.bf16.vlgmr.msra.gmra.mrb[0].mxu1 %vm263_vm3, %v231_v27 }
  0xca   : > { %2533 = vmatpush3.bf16.msra.mxu1 %v857_v29  ;;  %2534 = vmatprep.mubr.msk.bf16.mxu1 %vm2795_vm0, %v2794_v4 }
  0xcb   : > { %2538 = vmatprep.subr.bf16.mxu1 %v2794_v4 }
  0xcc   : > { %2464 = vmatmul.mubr.msk.bf16.vlgmr.msra.gmra.mrb[0].mxu0 %vm263_vm3, %v231_v27 }
  0xcd   : > { %860 = vmatpush1.bf16.msra.mxu0 %v851_v32  ;;  %891 = vmatprep.mubr.bf16.mxu0 %v2796_v6 }
  0xce   : > { %2469 = vmatprep.subr.msk.bf16.mxu0 %vm267_vm1, %v969_v33 }
  0xcf   : > { %v1321_v59 = vpop.permute.xlu0 %1320 }
  0xd5   : > { %2535 = vmatmul.mubr.msk.bf16.vlgmr.msra.gmra.mrb[0].mxu1 %vm263_vm3, %v232_v35 }
  0xd6   : > { %2539 = vmatpush3.bf16.msra.mxu1 %v980_v37  ;;  %2540 = vmatprep.mubr.msk.bf16.mxu1 %vm2795_vm0, %v2794_v4 }
  0xd7   : > { %2544 = vmatprep.subr.bf16.mxu1 %v2794_v4 }
  0xd8   : > { %2467 = vmatmul.mubr.msk.bf16.vlgmr.msra.gmra.mrb[0].mxu0 %vm263_vm3, %v232_v35 }
  0xd9   : > { %983 = vmatpush1.bf16.msra.mxu0 %v974_v40  ;;  %1014 = vmatprep.mubr.bf16.mxu0 %v2796_v6 }
  0xda   : > { %2472 = vmatprep.subr.msk.bf16.mxu0 %vm267_vm1, %v1092_v41 }
  0xe1   : > { %2541 = vmatmul.mubr.msk.bf16.vlgmr.msra.gmra.mrb[0].mxu1 %vm263_vm3, %v233_v43 }
  0xe2   : > { %2545 = vmatpush3.bf16.msra.mxu1 %v1103_v45  ;;  %2546 = vmatprep.mubr.msk.bf16.mxu1 %vm2795_vm0, %v2794_v4 }
  0xe3   : > { %2550 = vmatprep.subr.bf16.mxu1 %v2794_v4 }
  0xe4   : > { %2470 = vmatmul.mubr.msk.bf16.vlgmr.msra.gmra.mrb[0].mxu0 %vm263_vm3, %v233_v43 }
  0xe5   : > { %1106 = vmatpush1.bf16.msra.mxu0 %v1097_v48  ;;  %1137 = vmatprep.mubr.bf16.mxu0 %v2796_v6 }
  0xe6   : > { %2475 = vmatprep.subr.msk.bf16.mxu0 %vm267_vm1, %v1215_v49 }
  0xed   : > { %2547 = vmatmul.mubr.msk.bf16.vlgmr.msra.gmra.mrb[0].mxu1 %vm263_vm3, %v234_v50 }
  0xee   : > { %2551 = vmatpush3.bf16.msra.mxu1 %v1226_v52  ;;  %2552 = vmatprep.mubr.msk.bf16.mxu1 %vm2795_vm0, %v2794_v4 }
  0xf0   : > { %2473 = vmatmul.mubr.msk.bf16.vlgmr.msra.gmra.mrb[0].mxu0 %vm263_vm3, %v234_v50 }
  0xf1   : > { %1229 = vmatpush1.bf16.msra.mxu0 %v1220_v53  ;;  %1260 = vmatprep.mubr.bf16.mxu0 %v2796_v6 }
  0xf9   : > { %2553 = vmatmul.mubr.msk.bf16.vlgmr.msra.gmra.mrb[0].mxu1 %vm263_vm3, %v235_v54 }
  0xfc   : > { %2476 = vmatmul.mubr.msk.bf16.vlgmr.msra.gmra.mrb[0].mxu0 %vm263_vm3, %v235_v54 }
 0x1cc   : > { %v1303_v4 = vpop.f32.mrb[0].mxu1 }
 0x1cd   : > { %v1316_v6 = vmul.f32 %v1313_v58, %v1303_v4  ;;  %v2554_v61 = vpop.f32.mrb[1].mxu1 }
 0x1ce   : > { %v1306_v62 = vpop.f32.mrb[2].mxu1 }
 0x1cf   : > { %v3076_v63 = vadd.f32 %v1321_v59, %v1316_v6  ;;  %v1262_v0 = vpop.f32.mrb[0].mxu0  ;;  %v2555_v1 = vpop.f32.mrb[3].mxu1 }
 0x1d0   : > { %v1314_v2 = vmul.f32 %v1313_v58, %v1262_v0  ;;  %v1264_v5 = vpop.f32.mrb[1].mxu0 }
 0x1d1   : > { %v1315_v8 = vmul.f32 %v1313_v58, %v1264_v5  ;;  %v1266_v9 = vpop.f32.mrb[2].mxu0  ;;  %v2240_v10 = vrot.slane %v3076_v63, %v3074_v60  ;;  %v2233_v15 = vcombine.high %v3076_v63, %v3076_v63 }
 0x1d2   : > { %v1323_v11 = vadd.f32 %v1321_v59, %v1314_v2  ;;  %v1267_v12 = vpop.f32.mrb[3].mxu0 }
 0x1d3   : > { %v3086_v13 = vadd.f32 %v1321_v59, %v1315_v8  ;;  %v3089_v14 = vrot.slane %v2240_v10, %v3074_v60  ;;  %v2248_v20 = vcombine.high %v2240_v10, %v2240_v10  ;;  %v2247_v26 = vrot.slane %v2233_v15, %v3074_v60 }
 0x1d4   : > { %v1327_v16 = vcombine.high %v1323_v11, %v1323_v11  ;;  %v1334_v17 = vrot.slane %v1323_v11, %v3074_v60 }
 0x1d5   : > { %v1796_v18 = vrot.slane %v3086_v13, %v3074_v60  ;;  %v2285_v19 = vrot.slane %v3089_v14, %v3080_v7  ;;  %v1618_v24 = vcombine.low %v1323_v11, %v3086_v13  ;;  %v1619_v25 = vcombine.high %v1323_v11, %v3086_v13 }
 0x1d6   : > { %v1341_v21 = vrot.slane %v1327_v16, %v3074_v60  ;;  %v1342_v22 = vcombine.high %v1334_v17, %v1334_v17  ;;  %v1350_v23 = vrot.slane %v1334_v17, %v3074_v60  ;;  %v2270_v32 = vrot.slane %v2248_v20, %v3074_v60 }
 0x1d7   : > { %2314 = vrot.lane.b32.xlu0 %v2285_v19, %s2806_s8  ;;  %v1812_v33 = vrot.slane %v1796_v18, %v3074_v60  ;;  %v1626_v34 = vrot.slane %v1618_v24, %v3074_v60  ;;  %v1633_v38 = vrot.slane %v1619_v25, %v3074_v60  ;;  %v1789_v39 = vcombine.high %v3086_v13, %v3086_v13 }
 0x1d8   : > { %v1343_v27 = vcombine.high %v1341_v21, %v1341_v21  ;;  %v3105_v28 = vrot.slane %v1341_v21, %v3074_v60  ;;  %v1364_v29 = vrot.slane %v1342_v22, %v3074_v60  ;;  %v3108_v30 = vcombine.high %v1350_v23, %v1350_v23  ;;  %1385 = vst.msk [vmem:[%s3110_s9] sm:$0x1] %vm1384_vm11, %v1350_v23 }
 0x1d9   : > { %v3115_v31 = vrot.slane %v1350_v23, %v3080_v7  ;;  %v3151_v40 = vrot.slane %v1626_v34, %v3074_v60  ;;  %v2289_v41 = vrot.slane %v2270_v32, %v3080_v7  ;;  %v3155_v42 = vrot.slane %v1812_v33, %v3080_v7 }
 0x1da   : > { %v3121_v35 = vrot.slane %v1343_v27, %v3074_v60  ;;  %v3125_v36 = vcombine.high %v3105_v28, %v3105_v28  ;;  %v1374_v37 = vcombine.high %v1364_v29, %v1364_v29  ;;  %1386 = vst.msk [vmem:[%s3110_s9 + $0x10] sm:$0x1] %vm1384_vm11, %v1364_v29  ;;  %1387 = vst.msk [vmem:[%s3110_s9 + $0x20] sm:$0x1] %vm1384_vm11, %v3108_v30 }
 0x1db   : > { %1389 = vst.msk [vmem:[%s3110_s9 + $0x40] sm:$0x1] %vm1384_vm11, %v3105_v28  ;;  %1425 = vrot.lane.b32.xlu1 %v3115_v31, %s2799_s11  ;;  %1457 = vrot.lane.b32.xlu0 %v3115_v31, %s2802_s14  ;;  %v1804_v43 = vcombine.high %v1796_v18, %v1796_v18  ;;  %v2063_v44 = vcombine.low %v3086_v13, %v3076_v63 }
 0x1dc   : > { %1388 = vst.msk [vmem:[%s3110_s9 + $0x30] sm:$0x1] %vm1384_vm11, %v1374_v37  ;;  %1390 = vst.msk [vmem:[%s3110_s9 + $0x50] sm:$0x1] %vm1384_vm11, %v3121_v35  ;;  %v3160_v45 = vrot.slane %v1364_v29, %v3080_v7  ;;  %v3163_v46 = vrot.slane %v1633_v38, %v3074_v60  ;;  %v3166_v47 = vrot.slane %v2247_v26, %v3074_v60 }
 0x1dd   : > { %1391 = vst.msk [vmem:[%s3110_s9 + $0x60] sm:$0x1] %vm1384_vm11, %v3125_v36  ;;  %v2064_v48 = vcombine.high %v3086_v13, %v3076_v63  ;;  %v2071_v49 = vrot.slane %v2063_v44, %v3074_v60  ;;  %v2280_v50 = vcombine.high %v2270_v32, %v2270_v32  ;;  %v2249_v51 = vcombine.high %v2247_v26, %v2247_v26 }
 0x1de   : > { %v3176_v53 = vrot.slane %v1374_v37, %v3080_v7  ;;  %v3180_v54 = vrot.slane %v3121_v35, %v3080_v7  ;;  %v1671_v55 = vrot.slane %v3151_v40, %v3080_v7  ;;  %v3185_v56 = vrot.slane %v1804_v43, %v3074_v60 }
 0x1df   : > { %2316 = vrot.lane.b32.xlu1 %v2289_v41, %s2806_s8  ;;  %1489 = vrot.lane.b32.xlu0 %v3115_v31, %s2807_s10  ;;  %v2078_v52 = vrot.slane %v2064_v48, %v3074_v60  ;;  %v3188_v57 = vrot.slane %v2071_v49, %v3074_v60  ;;  %v3191_v58 = vrot.slane %v2280_v50, %v3080_v7  ;;  %v3208_v63 = vsub.s32 1, %v2907_v3 }
 0x1e0   : > { %v3194_v4 = vrot.slane %v2249_v51, %v3074_v60  ;;  %v2279_v59 = vcombine.high %v3166_v47, %v3166_v47  ;;  %v1703_v61 = vrot.slane %v3163_v46, %v3080_v7  ;;  %v1834_v62 = vcombine.high %v1812_v33, %v1812_v33 }
 0x1e1   : > { %v3199_v6 = vrot.slane %v2078_v52, %v3074_v60  ;;  %v2079_v0 = vcombine.high %v2071_v49, %v2071_v49  ;;  %v2080_v1 = vcombine.high %v2078_v52, %v2078_v52  ;;  %v1803_v9 = vrot.slane %v1789_v39, %v3074_v60 }
 0x1e2   : > { %v2305_v2 = vrot.slane %v3194_v4, %v3080_v7  ;;  %v2281_v5 = vcombine.high %v3194_v4, %v3194_v4  ;;  %v3215_v8 = vrot.slane %v1834_v62, %v3080_v7  ;;  %v1634_v10 = vcombine.high %v1626_v34, %v1626_v34 }
 0x1e3   : > { %1427 = vrot.lane.b32.xlu1 %v3160_v45, %s2799_s11  ;;  %1521 = vrot.lane.b32.xlu0 %v3115_v31, %s2808_s12  ;;  %v3220_v11 = vcombine.high %v3151_v40, %v3151_v40  ;;  %v1635_v3 = vcombine.high %v1633_v38, %v1633_v38  ;;  %v3224_v12 = vcombine.high %v3163_v46, %v3163_v46 }
 0x1e4   : > { %v1836_v13 = vcombine.high %v3185_v56, %v3185_v56  ;;  %v1819_v15 = vrot.slane %v1803_v9, %v3074_v60  ;;  %v3230_v16 = vrot.slane %v1634_v10, %v3074_v60  ;;  %v1805_v17 = vcombine.high %v1803_v9, %v1803_v9 }
 0x1e5   : > { %v2116_v18 = vrot.slane %v3188_v57, %v3080_v7  ;;  %v1691_v19 = vrot.slane %v3220_v11, %v3208_v63  ;;  %v3241_v20 = vrot.slane %v1635_v3, %v3074_v60  ;;  %v1723_v21 = vrot.slane %v3224_v12, %v3208_v63 }
 0x1e6   : > { %v3246_v22 = vrot.slane %v1819_v15, %v3080_v7  ;;  %v1683_v23 = vrot.slane %v3230_v16, %v3208_v63  ;;  %v3251_v24 = vrot.slane %v1836_v13, %v3080_v7  ;;  %v1833_v25 = vrot.slane %v1805_v17, %v3074_v60 }
 0x1e7   : > { %1459 = vrot.lane.b32.xlu1 %v3160_v45, %s2802_s14  ;;  %1553 = vrot.lane.b32.xlu0 %v3115_v31, %s2809_s13  ;;  %v1715_v26 = vrot.slane %v3241_v20, %v3208_v63  ;;  %v2148_v27 = vrot.slane %v3199_v6, %v3080_v7  ;;  %v3260_v29 = vrot.slane %v3125_v36, %v3080_v7 }
 0x1e8   : > { %v3263_v32 = vrot.slane %v2079_v0, %v3074_v60  ;;  %v3266_v33 = vrot.slane %v1833_v25, %v3080_v7  ;;  %v3270_v34 = vcombine.high %v3188_v57, %v3188_v57  ;;  %v1679_v37 = vrot.slane %v3230_v16, %v3080_v7 }
 0x1e9   : > { %v3275_v38 = vrot.slane %v2080_v1, %v3074_v60  ;;  %v1687_v39 = vrot.slane %v3220_v11, %v3080_v7  ;;  %v3287_v41 = vcombine.high %v3199_v6, %v3199_v6  ;;  %v1719_v44 = vrot.slane %v3224_v12, %v3080_v7 }
 0x1ea   : > { %v2128_v36 = vrot.slane %v3263_v32, %v3208_v63  ;;  %v2136_v60 = vrot.slane %v3270_v34, %v3208_v63  ;;  %v1835_v49 = vcombine.high %v1819_v15, %v1819_v15  ;;  %v1375_v50 = vcombine.high %v3121_v35, %v3121_v35 }
 0x1eb   : > { %1491 = vrot.lane.b32.xlu1 %v3160_v45, %s2807_s10  ;;  %1585 = vrot.lane.b32.xlu0 %v3115_v31, %s2810_s15  ;;  %v2160_v43 = vrot.slane %v3275_v38, %v3208_v63  ;;  %v1711_v31 = vrot.slane %v3241_v20, %v3080_v7  ;;  %v2168_v48 = vrot.slane %v3287_v41, %v3208_v63 }
 0x1ec   : > { %v2124_v51 = vrot.slane %v3263_v32, %v3080_v7  ;;  %v2132_v52 = vrot.slane %v3270_v34, %v3080_v7  ;;  %v3307_v62 = vcombine.high %v3230_v16, %v3230_v16  ;;  %v3313_v1 = vcombine.high %v3241_v20, %v3241_v20  ;;  %1392 = vst.msk [vmem:[%s3110_s9 + $0x70] sm:$0x1] %vm1384_vm11, %v1375_v50 }
 0x1ed   : > { %v3320_v35 = vrot.slane %v1835_v49, %v3080_v7  ;;  %v3323_v9 = vrot.slane %v1375_v50, %v3080_v7  ;;  %v1837_v15 = vcombine.high %v1833_v25, %v1833_v25  ;;  %v3339_v0 = vcombine.high %v3263_v32, %v3263_v32 }
 0x1ee   : > { %v1699_v3 = vrot.slane %v3307_v62, %v3208_v63  ;;  %v3343_v50 = vcombine.high %v3275_v38, %v3275_v38  ;;  %v3349_v10 = vrot.slane %v2279_v59, %v3080_v7  ;;  %v3358_v49 = vrot.slane %v2281_v5, %v3080_v7 }
 0x1ef   : > { %1523 = vrot.lane.b32.xlu1 %v3160_v45, %s2808_s12  ;;  %1870 = vrot.lane.b32.xlu0 %v3155_v42, %s2811_s16  ;;  %v3352_v25 = vrot.slane %v1837_v15, %v3080_v7  ;;  %v2140_v59 = vrot.slane %v3339_v0, %v3080_v7  ;;  %v1675_v13 = vrot.slane %v3151_v40, %v3208_v63 }
 0x1f0   : > { %v2172_v15 = vrot.slane %v3343_v50, %v3080_v7  ;;  %v1707_v5 = vrot.slane %v3163_v46, %v3208_v63  ;;  %v2278_v17 = vcombine.high %v3089_v14, %v3089_v14  ;;  %v1404_v14 = vrot.slane %v3108_v30, %v3080_v7 }
 0x1f1   : > { %v2152_v30 = vrot.slane %v3199_v6, %v3208_v63 }
 0x1f3   : > { %1555 = vrot.lane.b32.xlu1 %v3160_v45, %s2809_s13  ;;  %1902 = vrot.lane.b32.xlu0 %v3155_v42, %s2812_s2 }
 0x1f7   : > { %1587 = vrot.lane.b32.xlu1 %v3160_v45, %s2810_s15  ;;  %1934 = vrot.lane.b32.xlu0 %v3155_v42, %s2813_s23  ;;  %v1845_v45 = vrot.slane %v3185_v56, %v3080_v7 }
 0x1fb   : > { %1734 = vrot.lane.b32.xlu1 %v1675_v13, %s2814_s25  ;;  %1966 = vrot.lane.b32.xlu0 %v3155_v42, %s2815_s27  ;;  %v2293_v13 = vrot.slane %v2278_v17, %v3080_v7 }
 0x1ff   : > { %1750 = vrot.lane.b32.xlu1 %v1707_v5, %s2814_s25  ;;  %1998 = vrot.lane.b32.xlu0 %v3155_v42, %s2816_s30  ;;  %v2301_v5 = vrot.slane %v3166_v47, %v3080_v7  ;;  %v2120_v47 = vrot.slane %v3188_v57, %v3208_v63 }
 0x203   : > { %1872 = vrot.lane.b32.xlu1 %v1845_v45, %s2811_s16  ;;  %2030 = vrot.lane.b32.xlu0 %v3155_v42, %s2817_s5  ;;  %v1412_v42 = vrot.slane %v3105_v28, %v3080_v7 }
 0x207   : > { %1904 = vrot.lane.b32.xlu1 %v1845_v45, %s2812_s2  ;;  %2318 = vrot.lane.b32.xlu0 %v2293_v13, %s2806_s8 }
 0x20b   : > { %1936 = vrot.lane.b32.xlu1 %v1845_v45, %s2813_s23  ;;  %2322 = vrot.lane.b32.xlu0 %v2301_v5, %s2806_s8 }
 0x20f   : > { %1968 = vrot.lane.b32.xlu1 %v1845_v45, %s2815_s27  ;;  %1429 = vrot.lane.b32.xlu0 %v1404_v14, %s2799_s11 }
 0x213   : > { %2000 = vrot.lane.b32.xlu1 %v1845_v45, %s2816_s30  ;;  %1433 = vrot.lane.b32.xlu0 %v1412_v42, %s2799_s11 }
 0x217   : > { %2032 = vrot.lane.b32.xlu1 %v1845_v45, %s2817_s5  ;;  %1461 = vrot.lane.b32.xlu0 %v1404_v14, %s2802_s14 }
 0x21b   : > { %2179 = vrot.lane.b32.xlu1 %v2120_v47, %s2818_s7  ;;  %1465 = vrot.lane.b32.xlu0 %v1412_v42, %s2802_s14 }
 0x21f   : > { %2195 = vrot.lane.b32.xlu1 %v2152_v30, %s2818_s7  ;;  %1493 = vrot.lane.b32.xlu0 %v1404_v14, %s2807_s10 }
 0x223   : > { %2320 = vrot.lane.b32.xlu1 %v3191_v58, %s2806_s8  ;;  %1497 = vrot.lane.b32.xlu0 %v1412_v42, %s2807_s10 }
 0x227   : > { %2324 = vrot.lane.b32.xlu1 %v2305_v2, %s2806_s8  ;;  %1525 = vrot.lane.b32.xlu0 %v1404_v14, %s2808_s12 }
 0x22b   : > { %1431 = vrot.lane.b32.xlu1 %v3176_v53, %s2799_s11  ;;  %1529 = vrot.lane.b32.xlu0 %v1412_v42, %s2808_s12 }
 0x22f   : > { %1435 = vrot.lane.b32.xlu1 %v3180_v54, %s2799_s11  ;;  %1557 = vrot.lane.b32.xlu0 %v1404_v14, %s2809_s13 }
 0x233   : > { %1463 = vrot.lane.b32.xlu1 %v3176_v53, %s2802_s14  ;;  %1561 = vrot.lane.b32.xlu0 %v1412_v42, %s2809_s13 }
 0x237   : > { %1467 = vrot.lane.b32.xlu1 %v3180_v54, %s2802_s14  ;;  %1589 = vrot.lane.b32.xlu0 %v1404_v14, %s2810_s15 }
 0x23b   : > { %1495 = vrot.lane.b32.xlu1 %v3176_v53, %s2807_s10  ;;  %1593 = vrot.lane.b32.xlu0 %v1412_v42, %s2810_s15 }
 0x23f   : > { %1499 = vrot.lane.b32.xlu1 %v3180_v54, %s2807_s10  ;;  %1732 = vrot.lane.b32.xlu0 %v1671_v55, %s2814_s25 }
 0x243   : > { %1527 = vrot.lane.b32.xlu1 %v3176_v53, %s2808_s12  ;;  %1748 = vrot.lane.b32.xlu0 %v1703_v61, %s2814_s25 }
 0x247   : > { %1531 = vrot.lane.b32.xlu1 %v3180_v54, %s2808_s12  ;;  %1874 = vrot.lane.b32.xlu0 %v3215_v8, %s2811_s16 }
 0x249   : > { %v2315_v28 = vpop.permute.xlu0 %2314 }
 0x24a   : > { %2338 = vst.msk [vmem:[%s3110_s9 + $0xf] sm:$0x1] %vm1384_vm11, %v2315_v28 }
 0x24b   : > { %1559 = vrot.lane.b32.xlu1 %v3176_v53, %s2809_s13  ;;  %1878 = vrot.lane.b32.xlu0 %v3246_v22, %s2811_s16 }
 0x24d   : > { %v1426_v40 = vpop.permute.xlu1 %1425  ;;  %v1458_v46 = vpop.permute.xlu0 %1457 }
 0x24e   : > { %1449 = vst.msk [vmem:[%s3110_s9 + $0x1] sm:$0x1] %vm1384_vm11, %v1426_v40  ;;  %1481 = vst.msk [vmem:[%s3110_s9 + $0x2] sm:$0x1] %vm1384_vm11, %v1458_v46 }
 0x24f   : > { %1563 = vrot.lane.b32.xlu1 %v3180_v54, %s2809_s13  ;;  %1906 = vrot.lane.b32.xlu0 %v3215_v8, %s2812_s2 }
 0x251   : > { %v2317_v55 = vpop.permute.xlu1 %2316  ;;  %v1490_v56 = vpop.permute.xlu0 %1489 }
 0x252   : > { %2339 = vst.msk [vmem:[%s3110_s9 + $0x1f] sm:$0x1] %vm1384_vm11, %v2317_v55  ;;  %1513 = vst.msk [vmem:[%s3110_s9 + $0x3] sm:$0x1] %vm1384_vm11, %v1490_v56 }
 0x253   : > { %1591 = vrot.lane.b32.xlu1 %v3176_v53, %s2810_s15  ;;  %1910 = vrot.lane.b32.xlu0 %v3246_v22, %s2812_s2 }
 0x255   : > { %v1428_v58 = vpop.permute.xlu1 %1427  ;;  %v1522_v4 = vpop.permute.xlu0 %1521 }
 0x256   : > { %1450 = vst.msk [vmem:[%s3110_s9 + $0x11] sm:$0x1] %vm1384_vm11, %v1428_v58  ;;  %1545 = vst.msk [vmem:[%s3110_s9 + $0x4] sm:$0x1] %vm1384_vm11, %v1522_v4 }
 0x257   : > { %1595 = vrot.lane.b32.xlu1 %v3180_v54, %s2810_s15  ;;  %1938 = vrot.lane.b32.xlu0 %v3215_v8, %s2813_s23 }
 0x259   : > { %v1460_v53 = vpop.permute.xlu1 %1459  ;;  %v1554_v61 = vpop.permute.xlu0 %1553 }
 0x25a   : > { %1482 = vst.msk [vmem:[%s3110_s9 + $0x12] sm:$0x1] %vm1384_vm11, %v1460_v53  ;;  %1577 = vst.msk [vmem:[%s3110_s9 + $0x5] sm:$0x1] %vm1384_vm11, %v1554_v61 }
 0x25b   : > { %1738 = vrot.lane.b32.xlu1 %v1683_v23, %s2814_s25  ;;  %1942 = vrot.lane.b32.xlu0 %v3246_v22, %s2813_s23 }
 0x25d   : > { %v1492_v54 = vpop.permute.xlu1 %1491  ;;  %v1586_v2 = vpop.permute.xlu0 %1585 }
 0x25e   : > { %1514 = vst.msk [vmem:[%s3110_s9 + $0x13] sm:$0x1] %vm1384_vm11, %v1492_v54  ;;  %1609 = vst.msk [vmem:[%s3110_s9 + $0x6] sm:$0x1] %vm1384_vm11, %v1586_v2 }
 0x25f   : > { %1742 = vrot.lane.b32.xlu1 %v1691_v19, %s2814_s25  ;;  %1970 = vrot.lane.b32.xlu0 %v3215_v8, %s2815_s27 }
 0x261   : > { %v1524_v23 = vpop.permute.xlu1 %1523  ;;  %v1871_v17 = vpop.permute.xlu0 %1870 }
 0x262   : > { %1546 = vst.msk [vmem:[%s3110_s9 + $0x14] sm:$0x1] %vm1384_vm11, %v1524_v23  ;;  %1894 = vst.msk [vmem:[%s3110_s9 + $0x8] sm:$0x1] %vm1384_vm11, %v1871_v17 }
 0x263   : > { %1754 = vrot.lane.b32.xlu1 %v1715_v26, %s2814_s25  ;;  %1974 = vrot.lane.b32.xlu0 %v3246_v22, %s2815_s27 }
 0x265   : > { %v1556_v19 = vpop.permute.xlu1 %1555  ;;  %v1903_v45 = vpop.permute.xlu0 %1902 }
 0x266   : > { %1578 = vst.msk [vmem:[%s3110_s9 + $0x15] sm:$0x1] %vm1384_vm11, %v1556_v19  ;;  %1926 = vst.msk [vmem:[%s3110_s9 + $0x9] sm:$0x1] %vm1384_vm11, %v1903_v45 }
 0x267   : > { %1758 = vrot.lane.b32.xlu1 %v1723_v21, %s2814_s25  ;;  %2002 = vrot.lane.b32.xlu0 %v3215_v8, %s2816_s30 }
 0x269   : > { %v1588_v26 = vpop.permute.xlu1 %1587  ;;  %v1935_v13 = vpop.permute.xlu0 %1934 }
 0x26a   : > { %1610 = vst.msk [vmem:[%s3110_s9 + $0x16] sm:$0x1] %vm1384_vm11, %v1588_v26  ;;  %1958 = vst.msk [vmem:[%s3110_s9 + $0xa] sm:$0x1] %vm1384_vm11, %v1935_v13 }
 0x26b   : > { %1876 = vrot.lane.b32.xlu1 %v3251_v24, %s2811_s16  ;;  %2006 = vrot.lane.b32.xlu0 %v3246_v22, %s2816_s30 }
 0x26d   : > { %v3535_v5 = vpop.permute.xlu1 %1734  ;;  %v1967_v21 = vpop.permute.xlu0 %1966 }
 0x26e   : > { %1990 = vst.msk [vmem:[%s3110_s9 + $0xb] sm:$0x1] %vm1384_vm11, %v1967_v21 }
 0x26f   : > { %1880 = vrot.lane.b32.xlu1 %v3266_v33, %s2811_s16  ;;  %2177 = vrot.lane.b32.xlu0 %v2116_v18, %s2818_s7 }
 0x271   : > { %v3545_v14 = vpop.permute.xlu1 %1750  ;;  %v1999_v42 = vpop.permute.xlu0 %1998 }
 0x272   : > { %2022 = vst.msk [vmem:[%s3110_s9 + $0xc] sm:$0x1] %vm1384_vm11, %v1999_v42 }
 0x273   : > { %1908 = vrot.lane.b32.xlu1 %v3251_v24, %s2812_s2  ;;  %2193 = vrot.lane.b32.xlu0 %v2148_v27, %s2818_s7 }
 0x275   : > { %v1873_v47 = vpop.permute.xlu1 %1872  ;;  %v2031_v30 = vpop.permute.xlu0 %2030 }
 0x276   : > { %1895 = vst.msk [vmem:[%s3110_s9 + $0x18] sm:$0x1] %vm1384_vm11, %v1873_v47  ;;  %2054 = vst.msk [vmem:[%s3110_s9 + $0xd] sm:$0x1] %vm1384_vm11, %v2031_v30 }
 0x277   : > { %1912 = vrot.lane.b32.xlu1 %v3266_v33, %s2812_s2  ;;  %2034 = vrot.lane.b32.xlu0 %v3215_v8, %s2817_s5 }
 0x279   : > { %v1905_v57 = vpop.permute.xlu1 %1904  ;;  %v2319_v18 = vpop.permute.xlu0 %2318 }
 0x27a   : > { %1927 = vst.msk [vmem:[%s3110_s9 + $0x19] sm:$0x1] %vm1384_vm11, %v1905_v57  ;;  %2340 = vst.msk [vmem:[%s3110_s9 + $0x2f] sm:$0x1] %vm1384_vm11, %v2319_v18 }
 0x27b   : > { %1940 = vrot.lane.b32.xlu1 %v3251_v24, %s2813_s23  ;;  %2038 = vrot.lane.b32.xlu0 %v3246_v22, %s2817_s5 }
 0x27d   : > { %v1937_v6 = vpop.permute.xlu1 %1936  ;;  %v2323_v27 = vpop.permute.xlu0 %2322 }
 0x27e   : > { %1959 = vst.msk [vmem:[%s3110_s9 + $0x1a] sm:$0x1] %vm1384_vm11, %v1937_v6  ;;  %2342 = vst.msk [vmem:[%s3110_s9 + $0x4f] sm:$0x1] %vm1384_vm11, %v2323_v27 }
 0x27f   : > { %1944 = vrot.lane.b32.xlu1 %v3266_v33, %s2813_s23  ;;  %1437 = vrot.lane.b32.xlu0 %v3260_v29, %s2799_s11 }
 0x281   : > { %v1969_v8 = vpop.permute.xlu1 %1968  ;;  %v1430_v28 = vpop.permute.xlu0 %1429 }
 0x282   : > { %1991 = vst.msk [vmem:[%s3110_s9 + $0x1b] sm:$0x1] %vm1384_vm11, %v1969_v8  ;;  %1451 = vst.msk [vmem:[%s3110_s9 + $0x21] sm:$0x1] %vm1384_vm11, %v1430_v28 }
 0x283   : > { %1972 = vrot.lane.b32.xlu1 %v3251_v24, %s2815_s27  ;;  %1469 = vrot.lane.b32.xlu0 %v3260_v29, %s2802_s14 }
 0x285   : > { %v2001_v22 = vpop.permute.xlu1 %2000  ;;  %v1434_v40 = vpop.permute.xlu0 %1433 }
 0x286   : > { %2023 = vst.msk [vmem:[%s3110_s9 + $0x1c] sm:$0x1] %vm1384_vm11, %v2001_v22  ;;  %1453 = vst.msk [vmem:[%s3110_s9 + $0x41] sm:$0x1] %vm1384_vm11, %v1434_v40 }
 0x287   : > { %1976 = vrot.lane.b32.xlu1 %v3266_v33, %s2815_s27  ;;  %1501 = vrot.lane.b32.xlu0 %v3260_v29, %s2807_s10 }
 0x289   : > { %v2033_v46 = vpop.permute.xlu1 %2032  ;;  %v1462_v55 = vpop.permute.xlu0 %1461 }
 0x28a   : > { %2055 = vst.msk [vmem:[%s3110_s9 + $0x1d] sm:$0x1] %vm1384_vm11, %v2033_v46  ;;  %1483 = vst.msk [vmem:[%s3110_s9 + $0x22] sm:$0x1] %vm1384_vm11, %v1462_v55 }
 0x28b   : > { %2004 = vrot.lane.b32.xlu1 %v3251_v24, %s2816_s30  ;;  %1533 = vrot.lane.b32.xlu0 %v3260_v29, %s2808_s12 }
 0x28d   : > { %v3603_v56 = vpop.permute.xlu1 %2179  ;;  %v1466_v58 = vpop.permute.xlu0 %1465 }
 0x28e   : > { %1485 = vst.msk [vmem:[%s3110_s9 + $0x42] sm:$0x1] %vm1384_vm11, %v1466_v58 }
 0x28f   : > { %2008 = vrot.lane.b32.xlu1 %v3266_v33, %s2816_s30  ;;  %1565 = vrot.lane.b32.xlu0 %v3260_v29, %s2809_s13 }
 0x291   : > { %v3611_v4 = vpop.permute.xlu1 %2195  ;;  %v1494_v53 = vpop.permute.xlu0 %1493 }
 0x292   : > { %1515 = vst.msk [vmem:[%s3110_s9 + $0x23] sm:$0x1] %vm1384_vm11, %v1494_v53 }
 0x293   : > { %2183 = vrot.lane.b32.xlu1 %v2128_v36, %s2818_s7  ;;  %1597 = vrot.lane.b32.xlu0 %v3260_v29, %s2810_s15 }
 0x295   : > { %v2321_v61 = vpop.permute.xlu1 %2320  ;;  %v1498_v54 = vpop.permute.xlu0 %1497 }
 0x296   : > { %2341 = vst.msk [vmem:[%s3110_s9 + $0x3f] sm:$0x1] %vm1384_vm11, %v2321_v61  ;;  %1517 = vst.msk [vmem:[%s3110_s9 + $0x43] sm:$0x1] %vm1384_vm11, %v1498_v54 }
 0x297   : > { %2187 = vrot.lane.b32.xlu1 %v2136_v60, %s2818_s7  ;;  %1736 = vrot.lane.b32.xlu0 %v1679_v37, %s2814_s25 }
 0x299   : > { %v2325_v29 = vpop.permute.xlu1 %2324  ;;  %v1526_v36 = vpop.permute.xlu0 %1525 }
 0x29a   : > { %2343 = vst.msk [vmem:[%s3110_s9 + $0x5f] sm:$0x1] %vm1384_vm11, %v2325_v29  ;;  %1547 = vst.msk [vmem:[%s3110_s9 + $0x24] sm:$0x1] %vm1384_vm11, %v1526_v36 }
 0x29b   : > { %2199 = vrot.lane.b32.xlu1 %v2160_v43, %s2818_s7  ;;  %1740 = vrot.lane.b32.xlu0 %v1687_v39, %s2814_s25 }
 0x29d   : > { %v1432_v16 = vpop.permute.xlu1 %1431  ;;  %v1530_v37 = vpop.permute.xlu0 %1529 }
 0x29e   : > { %1452 = vst.msk [vmem:[%s3110_s9 + $0x31] sm:$0x1] %vm1384_vm11, %v1432_v16  ;;  %1549 = vst.msk [vmem:[%s3110_s9 + $0x44] sm:$0x1] %vm1384_vm11, %v1530_v37 }
 0x29f   : > { %2203 = vrot.lane.b32.xlu1 %v2168_v48, %s2818_s7  ;;  %1752 = vrot.lane.b32.xlu0 %v1711_v31, %s2814_s25 }
 0x2a1   : > { %v1436_v11 = vpop.permute.xlu1 %1435  ;;  %v1558_v39 = vpop.permute.xlu0 %1557 }
 0x2a2   : > { %1454 = vst.msk [vmem:[%s3110_s9 + $0x51] sm:$0x1] %vm1384_vm11, %v1436_v11  ;;  %1579 = vst.msk [vmem:[%s3110_s9 + $0x25] sm:$0x1] %vm1384_vm11, %v1558_v39 }
 0x2a3   : > { %2036 = vrot.lane.b32.xlu1 %v3251_v24, %s2817_s5  ;;  %1756 = vrot.lane.b32.xlu0 %v1719_v44, %s2814_s25 }
 0x2a5   : > { %v1464_v20 = vpop.permute.xlu1 %1463  ;;  %v1562_v60 = vpop.permute.xlu0 %1561 }
 0x2a6   : > { %1484 = vst.msk [vmem:[%s3110_s9 + $0x32] sm:$0x1] %vm1384_vm11, %v1464_v20  ;;  %1581 = vst.msk [vmem:[%s3110_s9 + $0x45] sm:$0x1] %vm1384_vm11, %v1562_v60 }
 0x2a7   : > { %2040 = vrot.lane.b32.xlu1 %v3266_v33, %s2817_s5  ;;  %1882 = vrot.lane.b32.xlu0 %v3320_v35, %s2811_s16 }
 0x2a9   : > { %v1468_v24 = vpop.permute.xlu1 %1467  ;;  %v1590_v43 = vpop.permute.xlu0 %1589 }
 0x2aa   : > { %1486 = vst.msk [vmem:[%s3110_s9 + $0x52] sm:$0x1] %vm1384_vm11, %v1468_v24  ;;  %1611 = vst.msk [vmem:[%s3110_s9 + $0x26] sm:$0x1] %vm1384_vm11, %v1590_v43 }
 0x2ab   : > { %1439 = vrot.lane.b32.xlu1 %v3323_v9, %s2799_s11  ;;  %1914 = vrot.lane.b32.xlu0 %v3320_v35, %s2812_s2  ;;  %s2483_s11 = sshll.u32 %s2783_s20, 11 }
 0x2ad   : > { %v1496_v12 = vpop.permute.xlu1 %1495  ;;  %v1594_v33 = vpop.permute.xlu0 %1593 }
 0x2ae   : > { %1516 = vst.msk [vmem:[%s3110_s9 + $0x33] sm:$0x1] %vm1384_vm11, %v1496_v12  ;;  %1613 = vst.msk [vmem:[%s3110_s9 + $0x46] sm:$0x1] %vm1384_vm11, %v1594_v33 }
 0x2af   : > { %1471 = vrot.lane.b32.xlu1 %v3323_v9, %s2802_s14  ;;  %1946 = vrot.lane.b32.xlu0 %v3320_v35, %s2813_s23  ;;  %s2362_s14 = sshll.u32 %s3110_s9, 4  ;;  %s3952_s14 = int_to_ptr.vmem [resolvable:$true] %s2362_s14 }
 0x2b0   : > { %s2713_s20 = scalar_lea.vmem %s3952_s14, 2048 }
 0x2b1   : > { %v1500_v31 = vpop.permute.xlu1 %1499  ;;  %v1733_v44 = vpop.permute.xlu0 %1732  ;;  %p2714_p12 = scmp.ne.s32.totalorder %s3952_s14, %s2713_s20 }
 0x2b2   : > { %1518 = vst.msk [vmem:[%s3110_s9 + $0x53] sm:$0x1] %vm1384_vm11, %v1500_v31  ;;  %v1765_v48 = vsel %vm1764_vm12, %v1733_v44, %v3535_v5 }
 0x2b3   : > { %1781 = vst.msk [vmem:[%s3110_s9 + $0x7] sm:$0x1] %vm1384_vm11, %v1765_v48  ;;  %1503 = vrot.lane.b32.xlu1 %v3323_v9, %s2807_s10  ;;  %1978 = vrot.lane.b32.xlu0 %v3320_v35, %s2815_s27  ;;  %p2715_p13 = pnand %p2714_p12, %p2890_p4 }
 0x2b5   : > { %v1528_v2 = vpop.permute.xlu1 %1527  ;;  %v1749_v23 = vpop.permute.xlu0 %1748  ;;  %p2716_p0 = pneg %p2715_p13 }
 0x2b6   : > { %1548 = vst.msk [vmem:[%s3110_s9 + $0x34] sm:$0x1] %vm1384_vm11, %v1528_v2  ;;  %v1769_v17 = vsel %vm1764_vm12, %v1749_v23, %v3545_v14 }
 0x2b7   : > { %1785 = vst.msk [vmem:[%s3110_s9 + $0x47] sm:$0x1] %vm1384_vm11, %v1769_v17  ;;  %1535 = vrot.lane.b32.xlu1 %v3323_v9, %s2808_s12  ;;  %2010 = vrot.lane.b32.xlu0 %v3320_v35, %s2816_s30  ;;  %s3950_s12 = scalar_lea.hbm %s4008_s4, %s2483_s11 }
 0x2b9   : > { %v1532_v19 = vpop.permute.xlu1 %1531  ;;  %v1875_v45 = vpop.permute.xlu0 %1874 }
 0x2ba   : > { %1550 = vst.msk [vmem:[%s3110_s9 + $0x54] sm:$0x1] %vm1384_vm11, %v1532_v19  ;;  %1896 = vst.msk [vmem:[%s3110_s9 + $0x28] sm:$0x1] %vm1384_vm11, %v1875_v45 }
 0x2bb   : > { %1567 = vrot.lane.b32.xlu1 %v3323_v9, %s2809_s13  ;;  %2181 = vrot.lane.b32.xlu0 %v2124_v51, %s2818_s7  ;;  %v4011_v51 = vrot.slane %v3275_v38, %v3080_v7  ;;  %s3958_s13 = scalar_lea.sflag [#allocation4], %s213_s6 }
 0x2bd   : > { %v1560_v26 = vpop.permute.xlu1 %1559  ;;  %v1879_v13 = vpop.permute.xlu0 %1878 }
 0x2be   : > { %1580 = vst.msk [vmem:[%s3110_s9 + $0x35] sm:$0x1] %vm1384_vm11, %v1560_v26  ;;  %1898 = vst.msk [vmem:[%s3110_s9 + $0x48] sm:$0x1] %vm1384_vm11, %v1879_v13 }
 0x2bf   : > { %1599 = vrot.lane.b32.xlu1 %v3323_v9, %s2810_s15  ;;  %2185 = vrot.lane.b32.xlu0 %v2132_v52, %s2818_s7  ;;  %v4012_v9 = vrot.slane %v3313_v1, %v3208_v63  ;;  %s2819_s15 = smov [#allocation3]  }
 0x2c1   : > { %v1564_v32 = vpop.permute.xlu1 %1563  ;;  %v1907_v5 = vpop.permute.xlu0 %1906 }
 0x2c2   : > { %1582 = vst.msk [vmem:[%s3110_s9 + $0x55] sm:$0x1] %vm1384_vm11, %v1564_v32  ;;  %1928 = vst.msk [vmem:[%s3110_s9 + $0x29] sm:$0x1] %vm1384_vm11, %v1907_v5 }
 0x2c3   : > { %1746 = vrot.lane.b32.xlu1 %v1699_v3, %s2814_s25  ;;  %2197 = vrot.lane.b32.xlu0 %v4011_v51, %s2818_s7  ;;  %v4013_v3 = vrot.slane %v3287_v41, %v3080_v7  ;;  %v4014_v41 = vrot.slane %v3307_v62, %v3080_v7 }
 0x2c5   : > { %v1592_v34 = vpop.permute.xlu1 %1591  ;;  %v1911_v52 = vpop.permute.xlu0 %1910 }
 0x2c6   : > { %1612 = vst.msk [vmem:[%s3110_s9 + $0x36] sm:$0x1] %vm1384_vm11, %v1592_v34  ;;  %1930 = vst.msk [vmem:[%s3110_s9 + $0x49] sm:$0x1] %vm1384_vm11, %v1911_v52 }
 0x2c7   : > { %1762 = vrot.lane.b32.xlu1 %v4012_v9, %s2814_s25  ;;  %2201 = vrot.lane.b32.xlu0 %v4013_v3, %s2818_s7 }
 0x2c9   : > { %v1596_v38 = vpop.permute.xlu1 %1595  ;;  %v1939_v21 = vpop.permute.xlu0 %1938 }
 0x2ca   : > { %1614 = vst.msk [vmem:[%s3110_s9 + $0x56] sm:$0x1] %vm1384_vm11, %v1596_v38  ;;  %1960 = vst.msk [vmem:[%s3110_s9 + $0x2a] sm:$0x1] %vm1384_vm11, %v1939_v21 }
 0x2cb   : > { %1884 = vrot.lane.b32.xlu1 %v3352_v25, %s2811_s16  ;;  %2042 = vrot.lane.b32.xlu0 %v3320_v35, %s2817_s5  ;;  %v4015_v35 = vrot.slane %v3313_v1, %v3080_v7  ;;  %s2717_s16 = sshll.u32 %s2819_s15, 4  ;;  %s2718_s16 = int_to_ptr.vmem [resolvable:$false] %s2717_s16 }
 0x2cc   : > { %p2720_p1 = scmp.lt.s32.totalorder %s3952_s14, %s2718_s16 }
 0x2cd   : > { %v3763_v14 = vpop.permute.xlu1 %1738  ;;  %v1943_v42 = vpop.permute.xlu0 %1942 }
 0x2ce   : > { %1962 = vst.msk [vmem:[%s3110_s9 + $0x4a] sm:$0x1] %vm1384_vm11, %v1943_v42 }
 0x2cf   : > { %1916 = vrot.lane.b32.xlu1 %v3352_v25, %s2812_s2  ;;  %1744 = vrot.lane.b32.xlu0 %v4014_v41, %s2814_s25  ;;  %s2719_s2 = scalar_lea.vmem %s2718_s16, 4096 }
 0x2d0   : > { %p2721_p2 = scmp.lt.s32.totalorder %s2719_s2, %s2713_s20 }
 0x2d1   : > { %v3773_v47 = vpop.permute.xlu1 %1742  ;;  %v1971_v30 = vpop.permute.xlu0 %1970 }
 0x2d2   : > { %1992 = vst.msk [vmem:[%s3110_s9 + $0x2b] sm:$0x1] %vm1384_vm11, %v1971_v30  ;;  %p2722_p3 = por %p2721_p2, %p2720_p1 }
 0x2d3   : > { %1948 = vrot.lane.b32.xlu1 %v3352_v25, %s2813_s23  ;;  %1760 = vrot.lane.b32.xlu0 %v4015_v35, %s2814_s25 }
 0x2d4   : > { %p2723_p5 = pnand %p2722_p3, %p2716_p0 }
 0x2d5   : > { %v3783_v57 = vpop.permute.xlu1 %1754  ;;  %v1975_v18 = vpop.permute.xlu0 %1974 }
 0x2d6   : > { %1994 = vst.msk [vmem:[%s3110_s9 + $0x4b] sm:$0x1] %vm1384_vm11, %v1975_v18 }
 0x2d7   : > { %1980 = vrot.lane.b32.xlu1 %v3352_v25, %s2815_s27  ;;  %2189 = vrot.lane.b32.xlu0 %v2140_v59, %s2818_s7  ;;  %v4016_v59 = vrot.slane %v3339_v0, %v3208_v63  ;;  %v4017_v0 = vrot.slane %v3343_v50, %v3208_v63 }
 0x2d9   : > { %v3793_v62 = vpop.permute.xlu1 %1758  ;;  %v2003_v6 = vpop.permute.xlu0 %2002 }
 0x2da   : > { %2024 = vst.msk [vmem:[%s3110_s9 + $0x2c] sm:$0x1] %vm1384_vm11, %v2003_v6 }
 0x2db   : > { %2012 = vrot.lane.b32.xlu1 %v3352_v25, %s2816_s30  ;;  %2205 = vrot.lane.b32.xlu0 %v2172_v15, %s2818_s7 }
 0x2dd   : > { %v1877_v1 = vpop.permute.xlu1 %1876  ;;  %v2007_v27 = vpop.permute.xlu0 %2006 }
 0x2de   : > { %1897 = vst.msk [vmem:[%s3110_s9 + $0x38] sm:$0x1] %vm1384_vm11, %v1877_v1  ;;  %2026 = vst.msk [vmem:[%s3110_s9 + $0x4c] sm:$0x1] %vm1384_vm11, %v2007_v27 }
 0x2df   : > { %2191 = vrot.lane.b32.xlu1 %v4016_v59, %s2818_s7  ;;  %2326 = vrot.lane.b32.xlu0 %v3349_v10, %s2806_s8 }
 0x2e1   : > { %v1881_v7 = vpop.permute.xlu1 %1880  ;;  %v2178_v8 = vpop.permute.xlu0 %2177 }
 0x2e2   : > { %1899 = vst.msk [vmem:[%s3110_s9 + $0x58] sm:$0x1] %vm1384_vm11, %v1881_v7  ;;  %v2209_v15 = vsel %vm263_vm3, %v2178_v8, %v3603_v56 }
 0x2e3   : > { %2225 = vst.msk [vmem:[%s3110_s9 + $0xe] sm:$0x1] %vm1384_vm11, %v2209_v15  ;;  %2207 = vrot.lane.b32.xlu1 %v4017_v0, %s2818_s7 }
 0x2e5   : > { %v1909_v28 = vpop.permute.xlu1 %1908  ;;  %v2194_v22 = vpop.permute.xlu0 %2193 }
 0x2e6   : > { %1929 = vst.msk [vmem:[%s3110_s9 + $0x39] sm:$0x1] %vm1384_vm11, %v1909_v28  ;;  %v2213_v10 = vsel %vm263_vm3, %v2194_v22, %v3611_v4 }
 0x2e7   : > { %2229 = vst.msk [vmem:[%s3110_s9 + $0x4e] sm:$0x1] %vm1384_vm11, %v2213_v10  ;;  %2044 = vrot.lane.b32.xlu1 %v3352_v25, %s2817_s5 }
 0x2e9   : > { %v1913_v40 = vpop.permute.xlu1 %1912  ;;  %v2035_v63 = vpop.permute.xlu0 %2034 }
 0x2ea   : > { %1931 = vst.msk [vmem:[%s3110_s9 + $0x59] sm:$0x1] %vm1384_vm11, %v1913_v40  ;;  %2056 = vst.msk [vmem:[%s3110_s9 + $0x2d] sm:$0x1] %vm1384_vm11, %v2035_v63 }
 0x2eb   : > { %2328 = vrot.lane.b32.xlu1 %v3358_v49, %s2806_s8 }
 0x2ed   : > { %v1941_v50 = vpop.permute.xlu1 %1940  ;;  %v2039_v46 = vpop.permute.xlu0 %2038 }
 0x2ee   : > { %1961 = vst.msk [vmem:[%s3110_s9 + $0x3a] sm:$0x1] %vm1384_vm11, %v1941_v50  ;;  %2058 = vst.msk [vmem:[%s3110_s9 + $0x4d] sm:$0x1] %vm1384_vm11, %v2039_v46 }
 0x2f1   : > { %v1945_v25 = vpop.permute.xlu1 %1944  ;;  %v1438_v55 = vpop.permute.xlu0 %1437 }
 0x2f2   : > { %1963 = vst.msk [vmem:[%s3110_s9 + $0x5a] sm:$0x1] %vm1384_vm11, %v1945_v25  ;;  %1455 = vst.msk [vmem:[%s3110_s9 + $0x61] sm:$0x1] %vm1384_vm11, %v1438_v55 }
 0x2f5   : > { %v1973_v56 = vpop.permute.xlu1 %1972  ;;  %v1470_v58 = vpop.permute.xlu0 %1469 }
 0x2f6   : > { %1993 = vst.msk [vmem:[%s3110_s9 + $0x3b] sm:$0x1] %vm1384_vm11, %v1973_v56  ;;  %1487 = vst.msk [vmem:[%s3110_s9 + $0x62] sm:$0x1] %vm1384_vm11, %v1470_v58 }
 0x2f9   : > { %v1977_v49 = vpop.permute.xlu1 %1976  ;;  %v1502_v4 = vpop.permute.xlu0 %1501 }
 0x2fa   : > { %1995 = vst.msk [vmem:[%s3110_s9 + $0x5b] sm:$0x1] %vm1384_vm11, %v1977_v49  ;;  %1519 = vst.msk [vmem:[%s3110_s9 + $0x63] sm:$0x1] %vm1384_vm11, %v1502_v4 }
 0x2fd   : > { %v2005_v53 = vpop.permute.xlu1 %2004  ;;  %v1534_v61 = vpop.permute.xlu0 %1533 }
 0x2fe   : > { %2025 = vst.msk [vmem:[%s3110_s9 + $0x3c] sm:$0x1] %vm1384_vm11, %v2005_v53  ;;  %1551 = vst.msk [vmem:[%s3110_s9 + $0x64] sm:$0x1] %vm1384_vm11, %v1534_v61 }
 0x301   : > { %v2009_v54 = vpop.permute.xlu1 %2008  ;;  %v1566_v29 = vpop.permute.xlu0 %1565 }
 0x302   : > { %2027 = vst.msk [vmem:[%s3110_s9 + $0x5c] sm:$0x1] %vm1384_vm11, %v2009_v54  ;;  %1583 = vst.msk [vmem:[%s3110_s9 + $0x65] sm:$0x1] %vm1384_vm11, %v1566_v29 }
 0x305   : > { %v2184_v36 = vpop.permute.xlu1 %2183  ;;  %v1598_v16 = vpop.permute.xlu0 %1597 }
 0x306   : > { %1615 = vst.msk [vmem:[%s3110_s9 + $0x66] sm:$0x1] %vm1384_vm11, %v1598_v16 }
 0x309   : > { %v2188_v37 = vpop.permute.xlu1 %2187  ;;  %v1737_v11 = vpop.permute.xlu0 %1736 }
 0x30a   : > { %v1766_v39 = vsel %vm1764_vm12, %v1737_v11, %v3763_v14 }
 0x30b   : > { %1782 = vst.msk [vmem:[%s3110_s9 + $0x17] sm:$0x1] %vm1384_vm11, %v1766_v39 }
 0x30d   : > { %v2200_v20 = vpop.permute.xlu1 %2199  ;;  %v1741_v60 = vpop.permute.xlu0 %1740 }
 0x30e   : > { %v1767_v24 = vsel %vm1764_vm12, %v1741_v60, %v3773_v47 }
 0x30f   : > { %1783 = vst.msk [vmem:[%s3110_s9 + $0x27] sm:$0x1] %vm1384_vm11, %v1767_v24 }
 0x311   : > { %v2204_v43 = vpop.permute.xlu1 %2203  ;;  %v1753_v12 = vpop.permute.xlu0 %1752 }
 0x312   : > { %v1770_v33 = vsel %vm1764_vm12, %v1753_v12, %v3783_v57 }
 0x313   : > { %1786 = vst.msk [vmem:[%s3110_s9 + $0x57] sm:$0x1] %vm1384_vm11, %v1770_v33 }
 0x315   : > { %v2037_v31 = vpop.permute.xlu1 %2036  ;;  %v1757_v44 = vpop.permute.xlu0 %1756 }
 0x316   : > { %2057 = vst.msk [vmem:[%s3110_s9 + $0x3d] sm:$0x1] %vm1384_vm11, %v2037_v31  ;;  %v1771_v48 = vsel %vm1764_vm12, %v1757_v44, %v3793_v62 }
 0x317   : > { %1787 = vst.msk [vmem:[%s3110_s9 + $0x67] sm:$0x1] %vm1384_vm11, %v1771_v48 }
 0x319   : > { %v2041_v2 = vpop.permute.xlu1 %2040  ;;  %v1883_v23 = vpop.permute.xlu0 %1882 }
 0x31a   : > { %2059 = vst.msk [vmem:[%s3110_s9 + $0x5d] sm:$0x1] %vm1384_vm11, %v2041_v2  ;;  %1900 = vst.msk [vmem:[%s3110_s9 + $0x68] sm:$0x1] %vm1384_vm11, %v1883_v23 }
 0x31d   : > { %v1440_v17 = vpop.permute.xlu1 %1439  ;;  %v1915_v19 = vpop.permute.xlu0 %1914 }
 0x31e   : > { %1456 = vst.msk [vmem:[%s3110_s9 + $0x71] sm:$0x1] %vm1384_vm11, %v1440_v17  ;;  %1932 = vst.msk [vmem:[%s3110_s9 + $0x69] sm:$0x1] %vm1384_vm11, %v1915_v19 }
 0x321   : > { %v1472_v45 = vpop.permute.xlu1 %1471  ;;  %v1947_v26 = vpop.permute.xlu0 %1946 }
 0x322   : > { %1488 = vst.msk [vmem:[%s3110_s9 + $0x72] sm:$0x1] %vm1384_vm11, %v1472_v45  ;;  %1964 = vst.msk [vmem:[%s3110_s9 + $0x6a] sm:$0x1] %vm1384_vm11, %v1947_v26 }
 0x325   : > { %v1504_v13 = vpop.permute.xlu1 %1503  ;;  %v1979_v32 = vpop.permute.xlu0 %1978 }
 0x326   : > { %1520 = vst.msk [vmem:[%s3110_s9 + $0x73] sm:$0x1] %vm1384_vm11, %v1504_v13  ;;  %1996 = vst.msk [vmem:[%s3110_s9 + $0x6b] sm:$0x1] %vm1384_vm11, %v1979_v32 }
 0x329   : > { %v1536_v5 = vpop.permute.xlu1 %1535  ;;  %v2011_v51 = vpop.permute.xlu0 %2010 }
 0x32a   : > { %1552 = vst.msk [vmem:[%s3110_s9 + $0x74] sm:$0x1] %vm1384_vm11, %v1536_v5  ;;  %2028 = vst.msk [vmem:[%s3110_s9 + $0x6c] sm:$0x1] %vm1384_vm11, %v2011_v51 }
 0x32d   : > { %v1568_v34 = vpop.permute.xlu1 %1567  ;;  %v2182_v52 = vpop.permute.xlu0 %2181 }
 0x32e   : > { %1584 = vst.msk [vmem:[%s3110_s9 + $0x75] sm:$0x1] %vm1384_vm11, %v1568_v34  ;;  %v2210_v9 = vsel %vm263_vm3, %v2182_v52, %v2184_v36 }
 0x32f   : > { %2226 = vst.msk [vmem:[%s3110_s9 + $0x1e] sm:$0x1] %vm1384_vm11, %v2210_v9 }
 0x331   : > { %v1600_v3 = vpop.permute.xlu1 %1599  ;;  %v2186_v38 = vpop.permute.xlu0 %2185 }
 0x332   : > { %1616 = vst.msk [vmem:[%s3110_s9 + $0x76] sm:$0x1] %vm1384_vm11, %v1600_v3  ;;  %v2211_v21 = vsel %vm263_vm3, %v2186_v38, %v2188_v37 }
 0x333   : > { %2227 = vst.msk [vmem:[%s3110_s9 + $0x2e] sm:$0x1] %vm1384_vm11, %v2211_v21 }
 0x335   : > { %v1747_v14 = vpop.permute.xlu1 %1746  ;;  %v2198_v42 = vpop.permute.xlu0 %2197 }
 0x336   : > { %v2214_v41 = vsel %vm263_vm3, %v2198_v42, %v2200_v20 }
 0x337   : > { %2230 = vst.msk [vmem:[%s3110_s9 + $0x5e] sm:$0x1] %vm1384_vm11, %v2214_v41 }
 0x339   : > { %v1763_v47 = vpop.permute.xlu1 %1762  ;;  %v2202_v30 = vpop.permute.xlu0 %2201 }
 0x33a   : > { %v2215_v35 = vsel %vm263_vm3, %v2202_v30, %v2204_v43 }
 0x33b   : > { %2231 = vst.msk [vmem:[%s3110_s9 + $0x6e] sm:$0x1] %vm1384_vm11, %v2215_v35 }
 0x33d   : > { %v1885_v57 = vpop.permute.xlu1 %1884  ;;  %v2043_v18 = vpop.permute.xlu0 %2042 }
 0x33e   : > { %1901 = vst.msk [vmem:[%s3110_s9 + $0x78] sm:$0x1] %vm1384_vm11, %v1885_v57  ;;  %2060 = vst.msk [vmem:[%s3110_s9 + $0x6d] sm:$0x1] %vm1384_vm11, %v2043_v18 }
 0x341   : > { %v1917_v62 = vpop.permute.xlu1 %1916  ;;  %v1745_v6 = vpop.permute.xlu0 %1744 }
 0x342   : > { %1933 = vst.msk [vmem:[%s3110_s9 + $0x79] sm:$0x1] %vm1384_vm11, %v1917_v62  ;;  %v1768_v1 = vsel %vm1764_vm12, %v1745_v6, %v1747_v14 }
 0x343   : > { %1784 = vst.msk [vmem:[%s3110_s9 + $0x37] sm:$0x1] %vm1384_vm11, %v1768_v1 }
 0x345   : > { %v1949_v27 = vpop.permute.xlu1 %1948  ;;  %v1761_v59 = vpop.permute.xlu0 %1760 }
 0x346   : > { %1965 = vst.msk [vmem:[%s3110_s9 + $0x7a] sm:$0x1] %vm1384_vm11, %v1949_v27  ;;  %v1772_v7 = vsel %vm1764_vm12, %v1761_v59, %v1763_v47 }
 0x347   : > { %1788 = vst.msk [vmem:[%s3110_s9 + $0x77] sm:$0x1] %vm1384_vm11, %v1772_v7 }
 0x349   : > { %v1981_v8 = vpop.permute.xlu1 %1980  ;;  %v2190_v15 = vpop.permute.xlu0 %2189 }
 0x34a   : > { %1997 = vst.msk [vmem:[%s3110_s9 + $0x7b] sm:$0x1] %vm1384_vm11, %v1981_v8 }
 0x34d   : > { %v2013_v0 = vpop.permute.xlu1 %2012  ;;  %v2206_v28 = vpop.permute.xlu0 %2205 }
 0x34e   : > { %2029 = vst.msk [vmem:[%s3110_s9 + $0x7c] sm:$0x1] %vm1384_vm11, %v2013_v0 }
 0x351   : > { %v2192_v22 = vpop.permute.xlu1 %2191  ;;  %v2327_v10 = vpop.permute.xlu0 %2326 }
 0x352   : > { %v2212_v40 = vsel %vm263_vm3, %v2190_v15, %v2192_v22  ;;  %2344 = vst.msk [vmem:[%s3110_s9 + $0x6f] sm:$0x1] %vm1384_vm11, %v2327_v10 }
 0x353   : > { %2228 = vst.msk [vmem:[%s3110_s9 + $0x3e] sm:$0x1] %vm1384_vm11, %v2212_v40 }
 0x355   : > { %v2208_v63 = vpop.permute.xlu1 %2207 }
 0x356   : > { %v2216_v50 = vsel %vm263_vm3, %v2206_v28, %v2208_v63 }
 0x357   : > { %2232 = vst.msk [vmem:[%s3110_s9 + $0x7e] sm:$0x1] %vm1384_vm11, %v2216_v50 }
 0x359   : > { %v2045_v46 = vpop.permute.xlu1 %2044 }
 0x35a   : > { %2061 = vst.msk [vmem:[%s3110_s9 + $0x7d] sm:$0x1] %vm1384_vm11, %v2045_v46 }
 0x35d   : > { %v2329_v25 = vpop.permute.xlu1 %2328 }
 0x35e   : > { %2345 = vst.msk [vmem:[%s3110_s9 + $0x7f] sm:$0x1] %vm1384_vm11, %v2329_v25 }
 0x35f   : > { %2726 = shalt.err (!%p2723_p5)
}
 0x360   : > { %s2727_s6 = scalar_lea.hbm %s3950_s12, 2048  ;;  %s2731_s25 = scalar_lea.hbm %s4008_s4, 4096 }
 0x361   : > { %p2728_p6 = scmp.ne.s32.totalorder %s3950_s12, %s2727_s6  ;;  %p2732_p10 = scmp.lt.u32.totalorder %s3950_s12, %s4008_s4 }
 0x362   : > { %p2733_p11 = scmp.lt.u32.totalorder %s2731_s25, %s2727_s6  ;;  %p2735_p13 = scmp.lt.u32.totalorder %s2727_s6, %s3950_s12 }
 0x363   : > { %p2729_p7 = pnand %p2728_p6, %p2890_p4 }
 0x364   : > { %p2734_p12 = por %p2733_p11, %p2732_p10 }
 0x365   : > { %p2730_p9 = pneg %p2729_p7 }
 0x366   : > { %p2736_p0 = por %p2735_p13, %p2734_p12 }
 0x368   : > { %p2737_p1 = pnand %p2736_p0, %p2730_p9 }
 0x36a   : > { %2740 = shalt.err (!%p2737_p1)
}
 0x36b   : > { %s2820_s5 = smov 128   ;;  %s2821_s7 = smov 8  }
 0x36c   : > { %2621 = dma.vmem_to_hbm [thread:$0]  (%p2890_p4), %s3952_s14, 2048, %s3950_s12, %s3958_s13, %s2820_s5, %s2820_s5, %s2821_s7  }
 0x36d PF: > { %p2627_p2 = scmp.ge.s32.totalorder %s2791_s22, 2  ;;  %s2377_s11 = sand.u32 1, %s2771_s17  }
 0x36e   : > { %s2378_s8 = scalar_lea.sflag [#allocation4], %s2377_s11 }
 0x36f   : > { %p2624_p3 = pnand %p2627_p2, %p2897_p8 }
 0x371   : > { %2766 = dma.done.wait (!%p2624_p3), %s2378_s8, 2048  }
 0x372   : > { %2768 = vsyncadd (!%p2624_p3), %s2378_s8, 4294965248  ;;  %s18_s22 = sadd.s32 1, %s2791_s22   ;;  %s4018_s17 = smov %s2775_s18 }
 0x373   : > { %p15_p5 = scmp.ge.s32.totalorder %s18_s22, 4   ;;  %s4019_s18 = smov %s2779_s19 }
 0x374   : > { %s4020_s19 = smov %s2903_s29  ;;  %s4021_s20 = smov %s2787_s21 }
 0x375   : > { %s4022_s21 = smov %s4024_s24  ;;  %17 = sbr.rel (!%p15_p5) target bundleno = 6 (0x6), region = 71 }
 0x37c   :  { %2383 = vsyncpa [#allocation4], 1 }
 0x37d   :  { %2385 = vsyncpa [#allocation4 + $0x1], 1 }

</bundles_post_ra>
